<compile_context>
chip_gen: v6e
topology: v6e:2x2x1
jax: 0.10.0
libtpu: 0.0.40
codegen_flags: <defaults>
</compile_context>

<pallas_src>
import jax
import jax.numpy as jnp
from jax.experimental import pallas as pl
from jax.experimental.pallas import tpu as pltpu

FEATURE_SIZE = 32   # `feature_size` is a free name in the reference module; fixed here.
LN_EPS = 1e-5       # torch.nn.LayerNorm default
_LANE = 128


def _ln_relu_t(y, g, beta):
    """LayerNorm over the feature (sublane) axis -> ReLU, one-pass statistics.

    y: (F, TB) f32; g, beta: (F, 1) f32.  mean(y) and mean(y*y) are independent
    reductions so the two cross-sublane reduces can overlap.
    """
    mu = jnp.mean(y, axis=0, keepdims=True)            # (1, TB)
    ms = jnp.mean(y * y, axis=0, keepdims=True)        # (1, TB)
    var = jnp.maximum(ms - mu * mu, 0.0)
    inv = jax.lax.rsqrt(var + LN_EPS)                  # EUP, lane-dense
    y = (y - mu) * inv * g + beta
    return jnp.maximum(y, 0.0)


def _dense_ln_relu_t(x_bf16, w_t, b, g, beta):
    """W^T @ X^T (+ b) -> LayerNorm -> ReLU.  Matmul in bf16, LN math in f32."""
    y = jnp.dot(w_t, x_bf16, preferred_element_type=jnp.float32) + b
    return _ln_relu_t(y, g, beta)


def ann_kernel(x_ref,
               w1_ref, b1_ref, g1_ref, be1_ref,
               w2a_ref, b2a_ref, g2a_ref, be2a_ref,
               w2b_ref, b2b_ref, g2b_ref, be2b_ref,
               w3ah_ref, w3al_ref, b3a_ref, g3a_ref, be3a_ref,
               w3b_ref, b3b_ref,
               out_ref):
    x = x_ref[...]                                     # (F, TB) bf16

    # nn1: Linear(F,128) + LN + ReLU                   -> (128, TB) f32
    x1 = _dense_ln_relu_t(x, w1_ref[...], b1_ref[...], g1_ref[...], be1_ref[...])
    x1_bf = x1.astype(jnp.bfloat16)

    # nn2: Linear(128,32)+LN+ReLU -> Linear(32,32)+LN+ReLU   -> (32, TB) f32
    h = _dense_ln_relu_t(x1_bf, w2a_ref[...], b2a_ref[...],
                         g2a_ref[...], be2a_ref[...])
    x2 = _dense_ln_relu_t(h.astype(jnp.bfloat16), w2b_ref[...], b2b_ref[...],
                          g2b_ref[...], be2b_ref[...])

    # nn3: Dropout(0.5) -> Linear(160,16)+LN+ReLU -> Linear(16,1)+Sigmoid
    # TODO(synk): nn.Dropout(0.5) implemented as eval-mode identity (no PRNG mask).
    # concat([x1, x2]) @ W  ==  W_hi^T @ x1 + W_lo^T @ x2   (no 160-wide relayout)
    y3 = (jnp.dot(w3ah_ref[...], x1_bf, preferred_element_type=jnp.float32)
          + jnp.dot(w3al_ref[...], x2.astype(jnp.bfloat16),
                    preferred_element_type=jnp.float32)
          + b3a_ref[...])
    h3 = _ln_relu_t(y3, g3a_ref[...], be3a_ref[...])   # (16, TB)

    # Linear(16,1): per-lane sublane reduce (VPU + tiny XLU); keeps MXU free.
    logit = jnp.sum(h3 * w3b_ref[...], axis=0, keepdims=True) + b3b_ref[...]
    out_ref[...] = jax.nn.sigmoid(logit)               # (1, TB), lane-dense store


def ann_forward(x, params, *, tb=2048):
    (w1, b1, g1, be1,
     w2a, b2a, g2a, be2a,
     w2b, b2b, g2b, be2b,
     w3a, b3a, g3a, be3a,
     w3b, b3b) = params

    B, F = x.shape

    def col(v):  # (1, N) row vector -> (N, 1) f32 column (per-sublane params)
        return v.reshape(-1, 1).astype(jnp.float32)

    # Pre-transposed (out, in) bf16 weight slabs so every stage is W^T @ X^T.
    weights = [
        w1.T.astype(jnp.bfloat16),  col(b1),  col(g1),  col(be1),
        w2a.T.astype(jnp.bfloat16), col(b2a), col(g2a), col(be2a),
        w2b.T.astype(jnp.bfloat16), col(b2b), col(g2b), col(be2b),
        w3a[:128, :].T.astype(jnp.bfloat16),          # (16, 128)
        w3a[128:, :].T.astype(jnp.bfloat16),          # (16, 32)
        col(b3a), col(g3a), col(be3a),
        w3b.reshape(-1, 1).astype(jnp.float32),       # (16, 1)
        b3b.reshape(1, 1).astype(jnp.float32),        # (1, 1)
    ]

    # Batch tile: lane-aligned (multiple of 128); capped so the grid has >= 2
    # steps whenever the batch allows it (keeps both v7x TensorCores busy).
    def rup(a, m):
        return ((a + m - 1) // m) * m
    tb = max(_LANE, (tb // _LANE) * _LANE)
    tb_eff = max(_LANE, min(tb, rup(pl.cdiv(B, 2), _LANE)))
    n_blk = pl.cdiv(B, tb_eff)
    b_pad = n_blk * tb_eff

    # Batch-on-lanes layout: stream x^T in (F, TB) bf16 blocks.
    xt = x.T.astype(jnp.bfloat16)
    if b_pad != B:
        xt = jnp.pad(xt, ((0, 0), (0, b_pad - B)))

    # x streams per batch block; every parameter is a full-array block with a
    # constant index_map so it stays VMEM-resident across all grid steps.
    in_specs = [pl.BlockSpec((F, tb_eff), lambda i: (0, i))]
    in_specs += [pl.BlockSpec(w.shape, lambda i: (0, 0)) for w in weights]

    out = pl.pallas_call(
        ann_kernel,
        out_shape=jax.ShapeDtypeStruct((1, b_pad), jnp.float32),
        grid=(n_blk,),
        in_specs=in_specs,
        out_specs=pl.BlockSpec((1, tb_eff), lambda i: (0, i)),
        compiler_params=pltpu.CompilerParams(
            dimension_semantics=("parallel",)),
    )(xt, *weights)
    return out[:, :B].T                                # (B, 1)


def _init_params(key):
    """Deterministic synthetic parameters matching the module's layer shapes."""
    def linear(key, fan_in, fan_out):
        kw, kb = jax.random.split(key)
        bound = 1.0 / jnp.sqrt(fan_in)
        w = jax.random.uniform(kw, (fan_in, fan_out), jnp.float32, -bound, bound)
        b = jax.random.uniform(kb, (1, fan_out), jnp.float32, -bound, bound)
        return w, b

    def ln(dim):
        return jnp.ones((1, dim), jnp.float32), jnp.zeros((1, dim), jnp.float32)

    keys = jax.random.split(key, 5)
    params = []
    # nn1: Linear(F,128)+LN
    w, b = linear(keys[0], FEATURE_SIZE, 128); g, be = ln(128)
    params += [w, b, g, be]
    # nn2[0]: Linear(128,32)+LN
    w, b = linear(keys[1], 128, 32); g, be = ln(32)
    params += [w, b, g, be]
    # nn2[1]: Linear(32,32)+LN
    w, b = linear(keys[2], 32, 32); g, be = ln(32)
    params += [w, b, g, be]
    # nn3[1]: Linear(160,16)+LN
    w, b = linear(keys[3], 160, 16); g, be = ln(16)
    params += [w, b, g, be]
    # nn3[2]: Linear(16,1), no norm
    w, b = linear(keys[4], 16, 1)
    params += [w, b]
    return params


def _reference(x, params):
    """Plain-JAX f32 reference matching the PyTorch formulation (two-pass LN)."""
    (w1, b1, g1, be1,
     w2a, b2a, g2a, be2a,
     w2b, b2b, g2b, be2b,
     w3a, b3a, g3a, be3a,
     w3b, b3b) = params

    def dlr(x, w, b, g, be):
        y = x @ w + b
        mu = y.mean(-1, keepdims=True)
        var = ((y - mu) ** 2).mean(-1, keepdims=True)
        y = (y - mu) / jnp.sqrt(var + LN_EPS) * g + be
        return jnp.maximum(y, 0.0)

    x1 = dlr(x, w1, b1, g1, be1)
    x2 = dlr(dlr(x1, w2a, b2a, g2a, be2a), w2b, b2b, g2b, be2b)
    xc = jnp.concatenate([x1, x2], axis=-1)
    h3 = dlr(xc, w3a, b3a, g3a, be3a)
    return jax.nn.sigmoid(h3 @ w3b + b3b)


if __name__ == "__main__":
    key = jax.random.PRNGKey(0)
    kx, kp = jax.random.split(key)

    B = 8
    x = jax.random.normal(kx, (B, FEATURE_SIZE), jnp.float32)
    params = _init_params(kp)

    out = ann_forward(x, params)
    out = jax.block_until_ready(out)

    ref = _reference(x, params)
    assert out.shape == (B, 1), out.shape
    # bf16 MXU operands + one-pass LN variance => ~1e-2-level drift vs f32 ref.
    assert jnp.allclose(out, ref, atol=5e-2, rtol=0.0), (out, ref)

    print("KERNEL_OK")
</pallas_src>

<mosaic_0001>
module attributes {stable_mosaic.version = 11 : i64} {
  func.func @ann_kernel(%arg0: i32, %arg1: memref<32x128xbf16, #tpu.memory_space<vmem>>, %arg2: memref<128x32xbf16, #tpu.memory_space<vmem>>, %arg3: memref<128x1xf32, #tpu.memory_space<vmem>>, %arg4: memref<128x1xf32, #tpu.memory_space<vmem>>, %arg5: memref<128x1xf32, #tpu.memory_space<vmem>>, %arg6: memref<32x128xbf16, #tpu.memory_space<vmem>>, %arg7: memref<32x1xf32, #tpu.memory_space<vmem>>, %arg8: memref<32x1xf32, #tpu.memory_space<vmem>>, %arg9: memref<32x1xf32, #tpu.memory_space<vmem>>, %arg10: memref<32x32xbf16, #tpu.memory_space<vmem>>, %arg11: memref<32x1xf32, #tpu.memory_space<vmem>>, %arg12: memref<32x1xf32, #tpu.memory_space<vmem>>, %arg13: memref<32x1xf32, #tpu.memory_space<vmem>>, %arg14: memref<16x128xbf16, #tpu.memory_space<vmem>>, %arg15: memref<16x32xbf16, #tpu.memory_space<vmem>>, %arg16: memref<16x1xf32, #tpu.memory_space<vmem>>, %arg17: memref<16x1xf32, #tpu.memory_space<vmem>>, %arg18: memref<16x1xf32, #tpu.memory_space<vmem>>, %arg19: memref<16x1xf32, #tpu.memory_space<vmem>>, %arg20: memref<1x1xf32, #tpu.memory_space<vmem>>, %arg21: memref<1x128xf32, #tpu.memory_space<vmem>>) attributes {dimension_semantics = [#tpu.dimension_semantics<parallel>], iteration_bounds = array<i64: 1>, scalar_prefetch = 0 : i64, scratch_operands = 0 : i64, tpu.core_type = #tpu.core_type<tc>, window_params = [{transform_indices = @transform_0, window_bounds = array<i64: 32, 128>}, {pipeline_mode = #tpu.pipeline_mode<synchronous>, transform_indices = @transform_1, window_bounds = array<i64: 128, 32>}, {pipeline_mode = #tpu.pipeline_mode<synchronous>, transform_indices = @transform_2, window_bounds = array<i64: 128, 1>}, {pipeline_mode = #tpu.pipeline_mode<synchronous>, transform_indices = @transform_3, window_bounds = array<i64: 128, 1>}, {pipeline_mode = #tpu.pipeline_mode<synchronous>, transform_indices = @transform_4, window_bounds = array<i64: 128, 1>}, {pipeline_mode = #tpu.pipeline_mode<synchronous>, transform_indices = @transform_5, window_bounds = array<i64: 32, 128>}, {pipeline_mode = #tpu.pipeline_mode<synchronous>, transform_indices = @transform_6, window_bounds = array<i64: 32, 1>}, {pipeline_mode = #tpu.pipeline_mode<synchronous>, transform_indices = @transform_7, window_bounds = array<i64: 32, 1>}, {pipeline_mode = #tpu.pipeline_mode<synchronous>, transform_indices = @transform_8, window_bounds = array<i64: 32, 1>}, {pipeline_mode = #tpu.pipeline_mode<synchronous>, transform_indices = @transform_9, window_bounds = array<i64: 32, 32>}, {pipeline_mode = #tpu.pipeline_mode<synchronous>, transform_indices = @transform_10, window_bounds = array<i64: 32, 1>}, {pipeline_mode = #tpu.pipeline_mode<synchronous>, transform_indices = @transform_11, window_bounds = array<i64: 32, 1>}, {pipeline_mode = #tpu.pipeline_mode<synchronous>, transform_indices = @transform_12, window_bounds = array<i64: 32, 1>}, {pipeline_mode = #tpu.pipeline_mode<synchronous>, transform_indices = @transform_13, window_bounds = array<i64: 16, 128>}, {pipeline_mode = #tpu.pipeline_mode<synchronous>, transform_indices = @transform_14, window_bounds = array<i64: 16, 32>}, {pipeline_mode = #tpu.pipeline_mode<synchronous>, transform_indices = @transform_15, window_bounds = array<i64: 16, 1>}, {pipeline_mode = #tpu.pipeline_mode<synchronous>, transform_indices = @transform_16, window_bounds = array<i64: 16, 1>}, {pipeline_mode = #tpu.pipeline_mode<synchronous>, transform_indices = @transform_17, window_bounds = array<i64: 16, 1>}, {pipeline_mode = #tpu.pipeline_mode<synchronous>, transform_indices = @transform_18, window_bounds = array<i64: 16, 1>}, {pipeline_mode = #tpu.pipeline_mode<synchronous>, transform_indices = @transform_19, window_bounds = array<i64: 1, 1>}, {transform_indices = @transform_20, window_bounds = array<i64: 1, 128>}]} {
    %c0 = arith.constant 0 : index
    %c0_0 = arith.constant 0 : index
    %0 = vector.load %arg1[%c0, %c0_0] : memref<32x128xbf16, #tpu.memory_space<vmem>>, vector<32x128xbf16>
    %c0_1 = arith.constant 0 : index
    %c0_2 = arith.constant 0 : index
    %1 = vector.load %arg2[%c0_1, %c0_2] : memref<128x32xbf16, #tpu.memory_space<vmem>>, vector<128x32xbf16>
    %c0_3 = arith.constant 0 : index
    %c0_4 = arith.constant 0 : index
    %2 = vector.load %arg3[%c0_3, %c0_4] : memref<128x1xf32, #tpu.memory_space<vmem>>, vector<128x1xf32>
    %c0_5 = arith.constant 0 : index
    %c0_6 = arith.constant 0 : index
    %3 = vector.load %arg4[%c0_5, %c0_6] : memref<128x1xf32, #tpu.memory_space<vmem>>, vector<128x1xf32>
    %c0_7 = arith.constant 0 : index
    %c0_8 = arith.constant 0 : index
    %4 = vector.load %arg5[%c0_7, %c0_8] : memref<128x1xf32, #tpu.memory_space<vmem>>, vector<128x1xf32>
    %cst = arith.constant dense<0.000000e+00> : vector<128x128xf32>
    %5 = tpu.matmul %1, %0, %cst {dimension_numbers = #tpu.dot_dimension_numbers<[1], [0], [0], [1], [0, 0, 1, 1], [], []>} : vector<128x32xbf16>, vector<32x128xbf16>, vector<128x128xf32> -> vector<128x128xf32>
    %6 = vector.broadcast %2 : vector<128x1xf32> to vector<128x128xf32>
    %7 = arith.addf %5, %6 : vector<128x128xf32>
    %cst_9 = arith.constant dense<0.000000e+00> : vector<128xf32>
    %8 = vector.multi_reduction <add>, %7, %cst_9 [0] : vector<128x128xf32> to vector<128xf32>
    %9 = vector.shape_cast %8 : vector<128xf32> to vector<1x128xf32>
    %cst_10 = arith.constant 1.280000e+02 : f32
    %10 = vector.broadcast %cst_10 : f32 to vector<1x128xf32>
    %11 = arith.divf %9, %10 : vector<1x128xf32>
    %12 = arith.mulf %7, %7 : vector<128x128xf32>
    %cst_11 = arith.constant dense<0.000000e+00> : vector<128xf32>
    %13 = vector.multi_reduction <add>, %12, %cst_11 [0] : vector<128x128xf32> to vector<128xf32>
    %14 = vector.shape_cast %13 : vector<128xf32> to vector<1x128xf32>
    %cst_12 = arith.constant 1.280000e+02 : f32
    %15 = vector.broadcast %cst_12 : f32 to vector<1x128xf32>
    %16 = arith.divf %14, %15 : vector<1x128xf32>
    %17 = arith.mulf %11, %11 : vector<1x128xf32>
    %18 = arith.subf %16, %17 : vector<1x128xf32>
    %cst_13 = arith.constant 0.000000e+00 : f32
    %19 = vector.broadcast %cst_13 : f32 to vector<1x128xf32>
    %20 = arith.maximumf %18, %19 : vector<1x128xf32>
    %cst_14 = arith.constant 9.99999974E-6 : f32
    %21 = vector.broadcast %cst_14 : f32 to vector<1x128xf32>
    %22 = arith.addf %20, %21 : vector<1x128xf32>
    %23 = math.rsqrt %22 : vector<1x128xf32>
    %24 = vector.broadcast %11 : vector<1x128xf32> to vector<128x128xf32>
    %25 = arith.subf %7, %24 : vector<128x128xf32>
    %26 = vector.broadcast %23 : vector<1x128xf32> to vector<128x128xf32>
    %27 = arith.mulf %25, %26 : vector<128x128xf32>
    %28 = vector.broadcast %3 : vector<128x1xf32> to vector<128x128xf32>
    %29 = arith.mulf %27, %28 : vector<128x128xf32>
    %30 = vector.broadcast %4 : vector<128x1xf32> to vector<128x128xf32>
    %31 = arith.addf %29, %30 : vector<128x128xf32>
    %cst_15 = arith.constant 0.000000e+00 : f32
    %32 = vector.broadcast %cst_15 : f32 to vector<128x128xf32>
    %33 = arith.maximumf %31, %32 : vector<128x128xf32>
    %34 = arith.truncf %33 : vector<128x128xf32> to vector<128x128xbf16>
    %c0_16 = arith.constant 0 : index
    %c0_17 = arith.constant 0 : index
    %35 = vector.load %arg6[%c0_16, %c0_17] : memref<32x128xbf16, #tpu.memory_space<vmem>>, vector<32x128xbf16>
    %c0_18 = arith.constant 0 : index
    %c0_19 = arith.constant 0 : index
    %36 = vector.load %arg7[%c0_18, %c0_19] : memref<32x1xf32, #tpu.memory_space<vmem>>, vector<32x1xf32>
    %c0_20 = arith.constant 0 : index
    %c0_21 = arith.constant 0 : index
    %37 = vector.load %arg8[%c0_20, %c0_21] : memref<32x1xf32, #tpu.memory_space<vmem>>, vector<32x1xf32>
    %c0_22 = arith.constant 0 : index
    %c0_23 = arith.constant 0 : index
    %38 = vector.load %arg9[%c0_22, %c0_23] : memref<32x1xf32, #tpu.memory_space<vmem>>, vector<32x1xf32>
    %cst_24 = arith.constant dense<0.000000e+00> : vector<32x128xf32>
    %39 = tpu.matmul %35, %34, %cst_24 {dimension_numbers = #tpu.dot_dimension_numbers<[1], [0], [0], [1], [0, 0, 1, 1], [], []>} : vector<32x128xbf16>, vector<128x128xbf16>, vector<32x128xf32> -> vector<32x128xf32>
    %40 = vector.broadcast %36 : vector<32x1xf32> to vector<32x128xf32>
    %41 = arith.addf %39, %40 : vector<32x128xf32>
    %cst_25 = arith.constant dense<0.000000e+00> : vector<128xf32>
    %42 = vector.multi_reduction <add>, %41, %cst_25 [0] : vector<32x128xf32> to vector<128xf32>
    %43 = vector.shape_cast %42 : vector<128xf32> to vector<1x128xf32>
    %cst_26 = arith.constant 3.200000e+01 : f32
    %44 = vector.broadcast %cst_26 : f32 to vector<1x128xf32>
    %45 = arith.divf %43, %44 : vector<1x128xf32>
    %46 = arith.mulf %41, %41 : vector<32x128xf32>
    %cst_27 = arith.constant dense<0.000000e+00> : vector<128xf32>
    %47 = vector.multi_reduction <add>, %46, %cst_27 [0] : vector<32x128xf32> to vector<128xf32>
    %48 = vector.shape_cast %47 : vector<128xf32> to vector<1x128xf32>
    %cst_28 = arith.constant 3.200000e+01 : f32
    %49 = vector.broadcast %cst_28 : f32 to vector<1x128xf32>
    %50 = arith.divf %48, %49 : vector<1x128xf32>
    %51 = arith.mulf %45, %45 : vector<1x128xf32>
    %52 = arith.subf %50, %51 : vector<1x128xf32>
    %cst_29 = arith.constant 0.000000e+00 : f32
    %53 = vector.broadcast %cst_29 : f32 to vector<1x128xf32>
    %54 = arith.maximumf %52, %53 : vector<1x128xf32>
    %cst_30 = arith.constant 9.99999974E-6 : f32
    %55 = vector.broadcast %cst_30 : f32 to vector<1x128xf32>
    %56 = arith.addf %54, %55 : vector<1x128xf32>
    %57 = math.rsqrt %56 : vector<1x128xf32>
    %58 = vector.broadcast %45 : vector<1x128xf32> to vector<32x128xf32>
    %59 = arith.subf %41, %58 : vector<32x128xf32>
    %60 = vector.broadcast %57 : vector<1x128xf32> to vector<32x128xf32>
    %61 = arith.mulf %59, %60 : vector<32x128xf32>
    %62 = vector.broadcast %37 : vector<32x1xf32> to vector<32x128xf32>
    %63 = arith.mulf %61, %62 : vector<32x128xf32>
    %64 = vector.broadcast %38 : vector<32x1xf32> to vector<32x128xf32>
    %65 = arith.addf %63, %64 : vector<32x128xf32>
    %cst_31 = arith.constant 0.000000e+00 : f32
    %66 = vector.broadcast %cst_31 : f32 to vector<32x128xf32>
    %67 = arith.maximumf %65, %66 : vector<32x128xf32>
    %68 = arith.truncf %67 : vector<32x128xf32> to vector<32x128xbf16>
    %c0_32 = arith.constant 0 : index
    %c0_33 = arith.constant 0 : index
    %69 = vector.load %arg10[%c0_32, %c0_33] : memref<32x32xbf16, #tpu.memory_space<vmem>>, vector<32x32xbf16>
    %c0_34 = arith.constant 0 : index
    %c0_35 = arith.constant 0 : index
    %70 = vector.load %arg11[%c0_34, %c0_35] : memref<32x1xf32, #tpu.memory_space<vmem>>, vector<32x1xf32>
    %c0_36 = arith.constant 0 : index
    %c0_37 = arith.constant 0 : index
    %71 = vector.load %arg12[%c0_36, %c0_37] : memref<32x1xf32, #tpu.memory_space<vmem>>, vector<32x1xf32>
    %c0_38 = arith.constant 0 : index
    %c0_39 = arith.constant 0 : index
    %72 = vector.load %arg13[%c0_38, %c0_39] : memref<32x1xf32, #tpu.memory_space<vmem>>, vector<32x1xf32>
    %cst_40 = arith.constant dense<0.000000e+00> : vector<32x128xf32>
    %73 = tpu.matmul %69, %68, %cst_40 {dimension_numbers = #tpu.dot_dimension_numbers<[1], [0], [0], [1], [0, 0, 1, 1], [], []>} : vector<32x32xbf16>, vector<32x128xbf16>, vector<32x128xf32> -> vector<32x128xf32>
    %74 = vector.broadcast %70 : vector<32x1xf32> to vector<32x128xf32>
    %75 = arith.addf %73, %74 : vector<32x128xf32>
    %cst_41 = arith.constant dense<0.000000e+00> : vector<128xf32>
    %76 = vector.multi_reduction <add>, %75, %cst_41 [0] : vector<32x128xf32> to vector<128xf32>
    %77 = vector.shape_cast %76 : vector<128xf32> to vector<1x128xf32>
    %cst_42 = arith.constant 3.200000e+01 : f32
    %78 = vector.broadcast %cst_42 : f32 to vector<1x128xf32>
    %79 = arith.divf %77, %78 : vector<1x128xf32>
    %80 = arith.mulf %75, %75 : vector<32x128xf32>
    %cst_43 = arith.constant dense<0.000000e+00> : vector<128xf32>
    %81 = vector.multi_reduction <add>, %80, %cst_43 [0] : vector<32x128xf32> to vector<128xf32>
    %82 = vector.shape_cast %81 : vector<128xf32> to vector<1x128xf32>
    %cst_44 = arith.constant 3.200000e+01 : f32
    %83 = vector.broadcast %cst_44 : f32 to vector<1x128xf32>
    %84 = arith.divf %82, %83 : vector<1x128xf32>
    %85 = arith.mulf %79, %79 : vector<1x128xf32>
    %86 = arith.subf %84, %85 : vector<1x128xf32>
    %cst_45 = arith.constant 0.000000e+00 : f32
    %87 = vector.broadcast %cst_45 : f32 to vector<1x128xf32>
    %88 = arith.maximumf %86, %87 : vector<1x128xf32>
    %cst_46 = arith.constant 9.99999974E-6 : f32
    %89 = vector.broadcast %cst_46 : f32 to vector<1x128xf32>
    %90 = arith.addf %88, %89 : vector<1x128xf32>
    %91 = math.rsqrt %90 : vector<1x128xf32>
    %92 = vector.broadcast %79 : vector<1x128xf32> to vector<32x128xf32>
    %93 = arith.subf %75, %92 : vector<32x128xf32>
    %94 = vector.broadcast %91 : vector<1x128xf32> to vector<32x128xf32>
    %95 = arith.mulf %93, %94 : vector<32x128xf32>
    %96 = vector.broadcast %71 : vector<32x1xf32> to vector<32x128xf32>
    %97 = arith.mulf %95, %96 : vector<32x128xf32>
    %98 = vector.broadcast %72 : vector<32x1xf32> to vector<32x128xf32>
    %99 = arith.addf %97, %98 : vector<32x128xf32>
    %cst_47 = arith.constant 0.000000e+00 : f32
    %100 = vector.broadcast %cst_47 : f32 to vector<32x128xf32>
    %101 = arith.maximumf %99, %100 : vector<32x128xf32>
    %c0_48 = arith.constant 0 : index
    %c0_49 = arith.constant 0 : index
    %102 = vector.load %arg14[%c0_48, %c0_49] : memref<16x128xbf16, #tpu.memory_space<vmem>>, vector<16x128xbf16>
    %cst_50 = arith.constant dense<0.000000e+00> : vector<16x128xf32>
    %103 = tpu.matmul %102, %34, %cst_50 {dimension_numbers = #tpu.dot_dimension_numbers<[1], [0], [0], [1], [0, 0, 1, 1], [], []>} : vector<16x128xbf16>, vector<128x128xbf16>, vector<16x128xf32> -> vector<16x128xf32>
    %c0_51 = arith.constant 0 : index
    %c0_52 = arith.constant 0 : index
    %104 = vector.load %arg15[%c0_51, %c0_52] : memref<16x32xbf16, #tpu.memory_space<vmem>>, vector<16x32xbf16>
    %105 = arith.truncf %101 : vector<32x128xf32> to vector<32x128xbf16>
    %cst_53 = arith.constant dense<0.000000e+00> : vector<16x128xf32>
    %106 = tpu.matmul %104, %105, %cst_53 {dimension_numbers = #tpu.dot_dimension_numbers<[1], [0], [0], [1], [0, 0, 1, 1], [], []>} : vector<16x32xbf16>, vector<32x128xbf16>, vector<16x128xf32> -> vector<16x128xf32>
    %107 = arith.addf %103, %106 : vector<16x128xf32>
    %c0_54 = arith.constant 0 : index
    %c0_55 = arith.constant 0 : index
    %108 = vector.load %arg16[%c0_54, %c0_55] : memref<16x1xf32, #tpu.memory_space<vmem>>, vector<16x1xf32>
    %109 = vector.broadcast %108 : vector<16x1xf32> to vector<16x128xf32>
    %110 = arith.addf %107, %109 : vector<16x128xf32>
    %c0_56 = arith.constant 0 : index
    %c0_57 = arith.constant 0 : index
    %111 = vector.load %arg17[%c0_56, %c0_57] : memref<16x1xf32, #tpu.memory_space<vmem>>, vector<16x1xf32>
    %c0_58 = arith.constant 0 : index
    %c0_59 = arith.constant 0 : index
    %112 = vector.load %arg18[%c0_58, %c0_59] : memref<16x1xf32, #tpu.memory_space<vmem>>, vector<16x1xf32>
    %cst_60 = arith.constant dense<0.000000e+00> : vector<128xf32>
    %113 = vector.multi_reduction <add>, %110, %cst_60 [0] : vector<16x128xf32> to vector<128xf32>
    %114 = vector.shape_cast %113 : vector<128xf32> to vector<1x128xf32>
    %cst_61 = arith.constant 1.600000e+01 : f32
    %115 = vector.broadcast %cst_61 : f32 to vector<1x128xf32>
    %116 = arith.divf %114, %115 : vector<1x128xf32>
    %117 = arith.mulf %110, %110 : vector<16x128xf32>
    %cst_62 = arith.constant dense<0.000000e+00> : vector<128xf32>
    %118 = vector.multi_reduction <add>, %117, %cst_62 [0] : vector<16x128xf32> to vector<128xf32>
    %119 = vector.shape_cast %118 : vector<128xf32> to vector<1x128xf32>
    %cst_63 = arith.constant 1.600000e+01 : f32
    %120 = vector.broadcast %cst_63 : f32 to vector<1x128xf32>
    %121 = arith.divf %119, %120 : vector<1x128xf32>
    %122 = arith.mulf %116, %116 : vector<1x128xf32>
    %123 = arith.subf %121, %122 : vector<1x128xf32>
    %cst_64 = arith.constant 0.000000e+00 : f32
    %124 = vector.broadcast %cst_64 : f32 to vector<1x128xf32>
    %125 = arith.maximumf %123, %124 : vector<1x128xf32>
    %cst_65 = arith.constant 9.99999974E-6 : f32
    %126 = vector.broadcast %cst_65 : f32 to vector<1x128xf32>
    %127 = arith.addf %125, %126 : vector<1x128xf32>
    %128 = math.rsqrt %127 : vector<1x128xf32>
    %129 = vector.broadcast %116 : vector<1x128xf32> to vector<16x128xf32>
    %130 = arith.subf %110, %129 : vector<16x128xf32>
    %131 = vector.broadcast %128 : vector<1x128xf32> to vector<16x128xf32>
    %132 = arith.mulf %130, %131 : vector<16x128xf32>
    %133 = vector.broadcast %111 : vector<16x1xf32> to vector<16x128xf32>
    %134 = arith.mulf %132, %133 : vector<16x128xf32>
    %135 = vector.broadcast %112 : vector<16x1xf32> to vector<16x128xf32>
    %136 = arith.addf %134, %135 : vector<16x128xf32>
    %cst_66 = arith.constant 0.000000e+00 : f32
    %137 = vector.broadcast %cst_66 : f32 to vector<16x128xf32>
    %138 = arith.maximumf %136, %137 : vector<16x128xf32>
    %c0_67 = arith.constant 0 : index
    %c0_68 = arith.constant 0 : index
    %139 = vector.load %arg19[%c0_67, %c0_68] : memref<16x1xf32, #tpu.memory_space<vmem>>, vector<16x1xf32>
    %140 = vector.broadcast %139 : vector<16x1xf32> to vector<16x128xf32>
    %141 = arith.mulf %138, %140 : vector<16x128xf32>
    %cst_69 = arith.constant dense<0.000000e+00> : vector<128xf32>
    %142 = vector.multi_reduction <add>, %141, %cst_69 [0] : vector<16x128xf32> to vector<128xf32>
    %143 = vector.shape_cast %142 : vector<128xf32> to vector<1x128xf32>
    %c0_70 = arith.constant 0 : index
    %c0_71 = arith.constant 0 : index
    %144 = vector.load %arg20[%c0_70, %c0_71] : memref<1x1xf32, #tpu.memory_space<vmem>>, vector<1x1xf32>
    %145 = vector.broadcast %144 : vector<1x1xf32> to vector<1x128xf32>
    %146 = arith.addf %143, %145 : vector<1x128xf32>
    %147 = arith.negf %146 : vector<1x128xf32>
    %148 = math.exp %147 : vector<1x128xf32>
    %cst_72 = arith.constant 1.000000e+00 : f32
    %149 = vector.broadcast %cst_72 : f32 to vector<1x128xf32>
    %150 = arith.addf %149, %148 : vector<1x128xf32>
    %151 = arith.divf %149, %150 : vector<1x128xf32>
    %c0_73 = arith.constant 0 : index
    %c0_74 = arith.constant 0 : index
    %152 = vector.load %arg21[%c0_73, %c0_74] : memref<1x128xf32, #tpu.memory_space<vmem>>, vector<1x128xf32>
    tpu.vector_store %arg21[%c0_73, %c0_74], %151 {strides = array<i32>} : memref<1x128xf32, #tpu.memory_space<vmem>>, vector<1x128xf32>,
    return
  }
  func.func @transform_0(%arg0: i32) -> (i32, i32) {
    %c0_i32 = arith.constant 0 : i32
    %c0_i32_0 = arith.constant 0 : i32
    return %c0_i32, %arg0 : i32, i32
  }
  func.func @transform_1(%arg0: i32) -> (i32, i32) {
    %c0_i32 = arith.constant 0 : i32
    %c0_i32_0 = arith.constant 0 : i32
    %c0_i32_1 = arith.constant 0 : i32
    return %c0_i32, %c0_i32_0 : i32, i32
  }
  func.func @transform_2(%arg0: i32) -> (i32, i32) {
    %c0_i32 = arith.constant 0 : i32
    %c0_i32_0 = arith.constant 0 : i32
    %c0_i32_1 = arith.constant 0 : i32
    return %c0_i32, %c0_i32_0 : i32, i32
  }
  func.func @transform_3(%arg0: i32) -> (i32, i32) {
    %c0_i32 = arith.constant 0 : i32
    %c0_i32_0 = arith.constant 0 : i32
    %c0_i32_1 = arith.constant 0 : i32
    return %c0_i32, %c0_i32_0 : i32, i32
  }
  func.func @transform_4(%arg0: i32) -> (i32, i32) {
    %c0_i32 = arith.constant 0 : i32
    %c0_i32_0 = arith.constant 0 : i32
    %c0_i32_1 = arith.constant 0 : i32
    return %c0_i32, %c0_i32_0 : i32, i32
  }
  func.func @transform_5(%arg0: i32) -> (i32, i32) {
    %c0_i32 = arith.constant 0 : i32
    %c0_i32_0 = arith.constant 0 : i32
    %c0_i32_1 = arith.constant 0 : i32
    return %c0_i32, %c0_i32_0 : i32, i32
  }
  func.func @transform_6(%arg0: i32) -> (i32, i32) {
    %c0_i32 = arith.constant 0 : i32
    %c0_i32_0 = arith.constant 0 : i32
    %c0_i32_1 = arith.constant 0 : i32
    return %c0_i32, %c0_i32_0 : i32, i32
  }
  func.func @transform_7(%arg0: i32) -> (i32, i32) {
    %c0_i32 = arith.constant 0 : i32
    %c0_i32_0 = arith.constant 0 : i32
    %c0_i32_1 = arith.constant 0 : i32
    return %c0_i32, %c0_i32_0 : i32, i32
  }
  func.func @transform_8(%arg0: i32) -> (i32, i32) {
    %c0_i32 = arith.constant 0 : i32
    %c0_i32_0 = arith.constant 0 : i32
    %c0_i32_1 = arith.constant 0 : i32
    return %c0_i32, %c0_i32_0 : i32, i32
  }
  func.func @transform_9(%arg0: i32) -> (i32, i32) {
    %c0_i32 = arith.constant 0 : i32
    %c0_i32_0 = arith.constant 0 : i32
    %c0_i32_1 = arith.constant 0 : i32
    return %c0_i32, %c0_i32_0 : i32, i32
  }
  func.func @transform_10(%arg0: i32) -> (i32, i32) {
    %c0_i32 = arith.constant 0 : i32
    %c0_i32_0 = arith.constant 0 : i32
    %c0_i32_1 = arith.constant 0 : i32
    return %c0_i32, %c0_i32_0 : i32, i32
  }
  func.func @transform_11(%arg0: i32) -> (i32, i32) {
    %c0_i32 = arith.constant 0 : i32
    %c0_i32_0 = arith.constant 0 : i32
    %c0_i32_1 = arith.constant 0 : i32
    return %c0_i32, %c0_i32_0 : i32, i32
  }
  func.func @transform_12(%arg0: i32) -> (i32, i32) {
    %c0_i32 = arith.constant 0 : i32
    %c0_i32_0 = arith.constant 0 : i32
    %c0_i32_1 = arith.constant 0 : i32
    return %c0_i32, %c0_i32_0 : i32, i32
  }
  func.func @transform_13(%arg0: i32) -> (i32, i32) {
    %c0_i32 = arith.constant 0 : i32
    %c0_i32_0 = arith.constant 0 : i32
    %c0_i32_1 = arith.constant 0 : i32
    return %c0_i32, %c0_i32_0 : i32, i32
  }
  func.func @transform_14(%arg0: i32) -> (i32, i32) {
    %c0_i32 = arith.constant 0 : i32
    %c0_i32_0 = arith.constant 0 : i32
    %c0_i32_1 = arith.constant 0 : i32
    return %c0_i32, %c0_i32_0 : i32, i32
  }
  func.func @transform_15(%arg0: i32) -> (i32, i32) {
    %c0_i32 = arith.constant 0 : i32
    %c0_i32_0 = arith.constant 0 : i32
    %c0_i32_1 = arith.constant 0 : i32
    return %c0_i32, %c0_i32_0 : i32, i32
  }
  func.func @transform_16(%arg0: i32) -> (i32, i32) {
    %c0_i32 = arith.constant 0 : i32
    %c0_i32_0 = arith.constant 0 : i32
    %c0_i32_1 = arith.constant 0 : i32
    return %c0_i32, %c0_i32_0 : i32, i32
  }
  func.func @transform_17(%arg0: i32) -> (i32, i32) {
    %c0_i32 = arith.constant 0 : i32
    %c0_i32_0 = arith.constant 0 : i32
    %c0_i32_1 = arith.constant 0 : i32
    return %c0_i32, %c0_i32_0 : i32, i32
  }
  func.func @transform_18(%arg0: i32) -> (i32, i32) {
    %c0_i32 = arith.constant 0 : i32
    %c0_i32_0 = arith.constant 0 : i32
    %c0_i32_1 = arith.constant 0 : i32
    return %c0_i32, %c0_i32_0 : i32, i32
  }
  func.func @transform_19(%arg0: i32) -> (i32, i32) {
    %c0_i32 = arith.constant 0 : i32
    %c0_i32_0 = arith.constant 0 : i32
    %c0_i32_1 = arith.constant 0 : i32
    return %c0_i32, %c0_i32_0 : i32, i32
  }
  func.func @transform_20(%arg0: i32) -> (i32, i32) {
    %c0_i32 = arith.constant 0 : i32
    %c0_i32_0 = arith.constant 0 : i32
    return %c0_i32, %arg0 : i32, i32
  }
}

</mosaic_0001>

<bundles_post_ra>
// kernel: tpu_custom_call.1
= control target key start
LH: loop header
LB: loop body
LE: loop exit
PB: predicated region body
PF: predicated region fallthrough
CT: control target
= control target key end

     0   :  { %s2191_s0 = inlined_call_operand.vmem [shape: bf16[32,128], index: 0, kind: input, shape index: {}]   ;;  %s2192_s1 = inlined_call_operand.vmem [shape: bf16[128,32], index: 1, kind: input, shape index: {}]   ;;  %s2193_s2 = inlined_call_operand.vmem [shape: f32[128,1], index: 2, kind: input, shape index: {}]   ;;  %s2194_s3 = inlined_call_operand.vmem [shape: f32[128,1], index: 3, kind: input, shape index: {}]   ;;  %s2195_s4 = inlined_call_operand.vmem [shape: f32[128,1], index: 4, kind: input, shape index: {}]   ;;  %s2196_s5 = inlined_call_operand.vmem [shape: bf16[32,128], index: 5, kind: input, shape index: {}]   ;;  %s2197_s6 = inlined_call_operand.vmem [shape: f32[32,1], index: 6, kind: input, shape index: {}]   ;;  %s2198_s7 = inlined_call_operand.vmem [shape: f32[32,1], index: 7, kind: input, shape index: {}]   ;;  %s2199_s8 = inlined_call_operand.vmem [shape: f32[32,1], index: 8, kind: input, shape index: {}]   ;;  %s2200_s9 = inlined_call_operand.vmem [shape: bf16[32,32], index: 9, kind: input, shape index: {}]   ;;  %s2201_s10 = inlined_call_operand.vmem [shape: f32[32,1], index: 10, kind: input, shape index: {}]   ;;  %s2202_s11 = inlined_call_operand.vmem [shape: f32[32,1], index: 11, kind: input, shape index: {}]   ;;  %s2203_s12 = inlined_call_operand.vmem [shape: f32[32,1], index: 12, kind: input, shape index: {}]   ;;  %s2204_s13 = inlined_call_operand.vmem [shape: bf16[16,128], index: 13, kind: input, shape index: {}]   ;;  %s2205_s14 = inlined_call_operand.vmem [shape: bf16[16,32], index: 14, kind: input, shape index: {}]   ;;  %s2206_s15 = inlined_call_operand.vmem [shape: f32[16,1], index: 15, kind: input, shape index: {}]   ;;  %s2207_s16 = inlined_call_operand.vmem [shape: f32[16,1], index: 16, kind: input, shape index: {}]   ;;  %s2208_s17 = inlined_call_operand.vmem [shape: f32[16,1], index: 17, kind: input, shape index: {}]   ;;  %s2209_s18 = inlined_call_operand.vmem [shape: f32[16,1], index: 18, kind: input, shape index: {}]   ;;  %s2210_s19 = inlined_call_operand.<no memory space> [shape: f32[1,1], index: 19, kind: input, shape index: {}]   ;;  %s2211_s20 = inlined_call_operand.hbm [shape: f32[1,128], index: 20, kind: output, shape index: {}]  }
   0x1   :  { %2217 = sst [smem:[#allocation6_spill]] %s2191_s0  ;;  %v25_v0 = vstv %s2210_s19 }
   0x2   :  { %2218 = sst [smem:[#allocation7_spill]] %s2192_s1  ;;  %26 = vst [vmem:[#allocation2] sm:$0x1] %v25_v0 }
   0x3   :  { %2219 = sst [smem:[#allocation8_spill]] %s2193_s2 }
   0x4   :  { %2220 = sst [smem:[#allocation9_spill]] %s2194_s3 }
   0x5   :  { %2221 = sst [smem:[#allocation10_spill]] %s2195_s4 }
   0x6   :  { %s2222_s2 = sld [smem:[#allocation8_spill]]  ;;  %v1507_v3 = vmov 0   ;;  %vm269_vm0 = vcmask 261120  }
   0x7   :  { %1456 = vset.pattern.permute.xlu1 %v1507_v3  ;;  %1455 = vset.pattern.permute.xlu0 %v1507_v3  ;;  %s2223_s28 = sld [smem:[#allocation6_spill]] }
   0x8   :  { %s2224_s23 = sld [smem:[#allocation7_spill]] }
   0x9   :  { %s2225_s0 = sld [smem:[#allocation9_spill]] }
   0xa   :  { %s2226_s3 = sld [smem:[#allocation10_spill]] }
   0xc   :  { %v91_v1 = vld [vmem:[%s2222_s2 + $0x10] sm:$0xff]  ;;  %v89_v2 = vld [vmem:[%s2222_s2] sm:$0xff]  ;;  %v92_v5 = vld [vmem:[%s2222_s2 + $0x18] sm:$0xff] }
   0xd   :  { %v1457_v4 = vld [vmem:[%s2223_s28 + $0x8] sm:$0xff]   ;;  %149 = vperm.xlu1 %1456, %v91_v1   ;;  %139 = vperm.xlu0 %1455, %v89_v2   ;;  %v1458_v7 = vld [vmem:[%s2223_s28] sm:$0xff]   ;;  %v96_v13 = vld [vmem:[%s2222_s2 + $0x38] sm:$0xff] }
   0xe   :  { %1375 = vmatprep.subr.bf16.mxu1 %v1457_v4  ;;  %v90_v6 = vld [vmem:[%s2222_s2 + $0x8] sm:$0xff]  ;;  %v1459_v8 = vld [vmem:[%s2224_s23] sm:$0xff]   ;;  %v1461_v12 = vld [vmem:[%s2224_s23 + $0x10] sm:$0xff]  }
   0xf   :  { %1376 = vmatpush3.bf16.msra.mxu1 %v1457_v4  ;;  %v94_v9 = vld [vmem:[%s2222_s2 + $0x28] sm:$0xff]  ;;  %v93_v10 = vld [vmem:[%s2222_s2 + $0x20] sm:$0xff]  ;;  %1379 = vmatprep.mubr.msk.bf16.mxu1 %vm269_vm0, %v1459_v8  ;;  %v95_v14 = vld [vmem:[%s2222_s2 + $0x30] sm:$0xff] }
  0x10   :  { %1377 = vmatprep.subr.bf16.mxu1 %v1458_v7  ;;  %v1460_v11 = vld [vmem:[%s2224_s23 + $0x8] sm:$0xff]   ;;  %v97_v16 = vld [vmem:[%s2222_s2 + $0x40] sm:$0xff]  ;;  %v1462_v17 = vld [vmem:[%s2224_s23 + $0x18] sm:$0xff]  }
  0x11   :  { %154 = vperm.xlu1 %1456, %v92_v5   ;;  %144 = vperm.xlu0 %1455, %v90_v6   ;;  %v98_v15 = vld [vmem:[%s2222_s2 + $0x48] sm:$0xff]  ;;  %v1463_v18 = vld [vmem:[%s2224_s23 + $0x20] sm:$0xff]   ;;  %v100_v19 = vld [vmem:[%s2222_s2 + $0x58] sm:$0xff] }
  0x12   :  { %v99_v20 = vld [vmem:[%s2222_s2 + $0x50] sm:$0xff]  ;;  %v102_v21 = vld [vmem:[%s2222_s2 + $0x68] sm:$0xff]  ;;  %v101_v22 = vld [vmem:[%s2222_s2 + $0x60] sm:$0xff] }
  0x13   :  { %1378 = vmatpush3.bf16.msra.mxu1 %v1458_v7  ;;  %v1464_v23 = vld [vmem:[%s2224_s23 + $0x28] sm:$0xff]   ;;  %v1465_v24 = vld [vmem:[%s2224_s23 + $0x30] sm:$0xff]   ;;  %v104_v25 = vld [vmem:[%s2222_s2 + $0x78] sm:$0xff] }
  0x14   :  { %v103_v26 = vld [vmem:[%s2222_s2 + $0x70] sm:$0xff]  ;;  %v120_v27 = vld [vmem:[%s2225_s0 + $0x78] sm:$0xff]  ;;  %v118_v32 = vld [vmem:[%s2225_s0 + $0x68] sm:$0xff] }
  0x15   :  { %164 = vperm.xlu1 %1456, %v94_v9   ;;  %159 = vperm.xlu0 %1455, %v93_v10   ;;  %v119_v28 = vld [vmem:[%s2225_s0 + $0x70] sm:$0xff]  ;;  %v1466_v29 = vld [vmem:[%s2224_s23 + $0x38] sm:$0xff]   ;;  %v117_v33 = vld [vmem:[%s2225_s0 + $0x60] sm:$0xff] }
  0x16   :  { %1380 = vmatmul.mubr.msk.bf16.vlgmr.msra.gmra.mxu1 %vm269_vm0, %v1460_v11  ;;  %v136_v30 = vld [vmem:[%s2226_s3 + $0x78] sm:$0xff]  ;;  %v135_v31 = vld [vmem:[%s2226_s3 + $0x70] sm:$0xff] }
  0x17   :  { %1383 = vmatprep.mubr.msk.bf16.mxu1 %vm269_vm0, %v1461_v12 }
  0x19   :  { %174 = vperm.xlu1 %1456, %v96_v13   ;;  %169 = vperm.xlu0 %1455, %v95_v14  }
  0x1d   :  { %184 = vperm.xlu1 %1456, %v98_v15   ;;  %179 = vperm.xlu0 %1455, %v97_v16  }
  0x1e   :  { %1384 = vmatmul.mubr.msk.bf16.gmra.mxu1 %vm269_vm0, %v1462_v17 }
  0x1f   :  { %1387 = vmatprep.mubr.msk.bf16.mxu1 %vm269_vm0, %v1463_v18 }
  0x21   :  { %194 = vperm.xlu1 %1456, %v100_v19   ;;  %189 = vperm.xlu0 %1455, %v99_v20  }
  0x25   :  { %204 = vperm.xlu1 %1456, %v102_v21   ;;  %199 = vperm.xlu0 %1455, %v101_v22  }
  0x26   :  { %1388 = vmatmul.mubr.msk.bf16.gmra.mxu1 %vm269_vm0, %v1464_v23 }
  0x27   :  { %1391 = vmatprep.mubr.msk.bf16.mxu1 %vm269_vm0, %v1465_v24 }
  0x29   :  { %214 = vperm.xlu1 %1456, %v104_v25   ;;  %209 = vperm.xlu0 %1455, %v103_v26  }
  0x2d   :  { %566 = vperm.xlu1 %1456, %v120_v27   ;;  %561 = vperm.xlu0 %1455, %v119_v28  }
  0x2e   :  { %1392 = vmatmul.mubr.msk.bf16.gmra.mxu1 %vm269_vm0, %v1466_v29 }
  0x31   :  { %662 = vperm.xlu1 %1456, %v136_v30   ;;  %657 = vperm.xlu0 %1455, %v135_v31  }
  0x32   :  { %27 = vsyncpa [#allocation4], 0  ;;  %v134_v34 = vld [vmem:[%s2226_s3 + $0x68] sm:$0xff]  ;;  %v133_v35 = vld [vmem:[%s2226_s3 + $0x60] sm:$0xff]  ;;  %vm1509_vm1 = vmmov 0  }
  0x33   :  { %v116_v36 = vld [vmem:[%s2225_s0 + $0x58] sm:$0xff]  ;;  %v115_v37 = vld [vmem:[%s2225_s0 + $0x50] sm:$0xff]  ;;  %v114_v40 = vld [vmem:[%s2225_s0 + $0x48] sm:$0xff] }
  0x34   :  { %v132_v38 = vld [vmem:[%s2226_s3 + $0x58] sm:$0xff]  ;;  %v131_v39 = vld [vmem:[%s2226_s3 + $0x50] sm:$0xff]  ;;  %v113_v41 = vld [vmem:[%s2225_s0 + $0x40] sm:$0xff] }
  0x35   :  { %556 = vperm.xlu1 %1456, %v118_v32   ;;  %551 = vperm.xlu0 %1455, %v117_v33   ;;  %v130_v42 = vld [vmem:[%s2226_s3 + $0x48] sm:$0xff]  ;;  %v129_v43 = vld [vmem:[%s2226_s3 + $0x40] sm:$0xff]  ;;  %v112_v44 = vld [vmem:[%s2225_s0 + $0x38] sm:$0xff] }
  0x36   :  { %v111_v45 = vld [vmem:[%s2225_s0 + $0x30] sm:$0xff]  ;;  %v128_v46 = vld [vmem:[%s2226_s3 + $0x38] sm:$0xff]  ;;  %v110_v48 = vld [vmem:[%s2225_s0 + $0x28] sm:$0xff] }
  0x37   :  { %v127_v47 = vld [vmem:[%s2226_s3 + $0x30] sm:$0xff]  ;;  %v109_v49 = vld [vmem:[%s2225_s0 + $0x20] sm:$0xff]  ;;  %v126_v50 = vld [vmem:[%s2226_s3 + $0x28] sm:$0xff] }
  0x38   :  { %v125_v51 = vld [vmem:[%s2226_s3 + $0x20] sm:$0xff]  ;;  %v108_v52 = vld [vmem:[%s2225_s0 + $0x18] sm:$0xff]  ;;  %v107_v53 = vld [vmem:[%s2225_s0 + $0x10] sm:$0xff] }
  0x39   :  { %652 = vperm.xlu1 %1456, %v134_v34   ;;  %647 = vperm.xlu0 %1455, %v133_v35   ;;  %v124_v54 = vld [vmem:[%s2226_s3 + $0x18] sm:$0xff]  ;;  %v123_v55 = vld [vmem:[%s2226_s3 + $0x10] sm:$0xff]  ;;  %v106_v56 = vld [vmem:[%s2225_s0 + $0x8] sm:$0xff] }
  0x3a   :  { %v105_v57 = vld [vmem:[%s2225_s0] sm:$0xff]  ;;  %v122_v58 = vld [vmem:[%s2226_s3 + $0x8] sm:$0xff]  ;;  %v712_v62 = vld [vmem:[%s2197_s6 + $0x18] sm:$0xff] }
  0x3b   :  { %v121_v59 = vld [vmem:[%s2226_s3] sm:$0xff]  ;;  %v710_v60 = vld [vmem:[%s2197_s6 + $0x8] sm:$0xff]  ;;  %v711_v63 = vld [vmem:[%s2197_s6 + $0x10] sm:$0xff] }
  0x3c   :  { %v709_v61 = vld [vmem:[%s2197_s6] sm:$0xff]  ;;  %v716_v0 = vld [vmem:[%s2198_s7 + $0x18] sm:$0xff]  ;;  %v715_v1 = vld [vmem:[%s2198_s7 + $0x10] sm:$0xff] }
  0x3d   :  { %546 = vperm.xlu1 %1456, %v116_v36   ;;  %541 = vperm.xlu0 %1455, %v115_v37   ;;  %v720_v2 = vld [vmem:[%s2199_s8 + $0x18] sm:$0xff]  ;;  %v719_v3 = vld [vmem:[%s2199_s8 + $0x10] sm:$0xff]  ;;  %v714_v4 = vld [vmem:[%s2198_s7 + $0x8] sm:$0xff] }
  0x3e   :  { %v713_v5 = vld [vmem:[%s2198_s7] sm:$0xff]  ;;  %v718_v6 = vld [vmem:[%s2199_s8 + $0x8] sm:$0xff]  ;;  %v901_v10 = vld [vmem:[%s2201_s10 + $0x18] sm:$0xff] }
  0x3f   :  { %v717_v7 = vld [vmem:[%s2199_s8] sm:$0xff]  ;;  %v899_v8 = vld [vmem:[%s2201_s10 + $0x8] sm:$0xff]  ;;  %v900_v11 = vld [vmem:[%s2201_s10 + $0x10] sm:$0xff] }
  0x40   :  { %v898_v9 = vld [vmem:[%s2201_s10] sm:$0xff]  ;;  %v905_v12 = vld [vmem:[%s2202_s11 + $0x18] sm:$0xff]  ;;  %v904_v13 = vld [vmem:[%s2202_s11 + $0x10] sm:$0xff] }
  0x41   :  { %642 = vperm.xlu1 %1456, %v132_v38   ;;  %637 = vperm.xlu0 %1455, %v131_v39   ;;  %v909_v14 = vld [vmem:[%s2203_s12 + $0x18] sm:$0xff]  ;;  %v908_v15 = vld [vmem:[%s2203_s12 + $0x10] sm:$0xff]  ;;  %v903_v16 = vld [vmem:[%s2202_s11 + $0x8] sm:$0xff] }
  0x42   :  { %v902_v17 = vld [vmem:[%s2202_s11] sm:$0xff]  ;;  %v907_v18 = vld [vmem:[%s2203_s12 + $0x8] sm:$0xff] }
  0x43   :  { %v906_v19 = vld [vmem:[%s2203_s12] sm:$0xff]  ;;  %v1187_v20 = vld [vmem:[%s2206_s15 + $0x8] sm:$0xff] }
  0x44   :  { %v1186_v21 = vld [vmem:[%s2206_s15] sm:$0xff]  ;;  %v1201_v22 = vld [vmem:[%s2207_s16 + $0x8] sm:$0xff] }
  0x45   :  { %536 = vperm.xlu1 %1456, %v114_v40   ;;  %531 = vperm.xlu0 %1455, %v113_v41   ;;  %v1200_v23 = vld [vmem:[%s2207_s16] sm:$0xff]  ;;  %v1203_v24 = vld [vmem:[%s2208_s17 + $0x8] sm:$0xff] }
  0x46   :  { %v1202_v25 = vld [vmem:[%s2208_s17] sm:$0xff]  ;;  %v1259_v27 = vld [vmem:[%s2209_s18 + $0x8] sm:$0xff] }
  0x47   :  { %v1258_v28 = vld [vmem:[%s2209_s18] sm:$0xff] }
  0x48   :  { %v1279_v30 = vld [vmem:[#allocation2] sm:$0x1] }
  0x49   :  { %632 = vperm.xlu1 %1456, %v130_v42   ;;  %627 = vperm.xlu0 %1455, %v129_v43   ;;  %v1467_v41 = vld [vmem:[%s2196_s5] sm:$0xff]  }
  0x4a   :  { %1411 = vmatprep.mubr.bf16.mxu1 %v1467_v41 }
  0x4d   :  { %526 = vperm.xlu1 %1456, %v112_v44   ;;  %521 = vperm.xlu0 %1455, %v111_v45  }
  0x51   :  { %622 = vperm.xlu1 %1456, %v128_v46   ;;  %617 = vperm.xlu0 %1455, %v127_v47  }
  0x55   :  { %516 = vperm.xlu1 %1456, %v110_v48   ;;  %511 = vperm.xlu0 %1455, %v109_v49  }
  0x59   :  { %612 = vperm.xlu1 %1456, %v126_v50   ;;  %607 = vperm.xlu0 %1455, %v125_v51  }
  0x5d   :  { %506 = vperm.xlu1 %1456, %v108_v52   ;;  %501 = vperm.xlu0 %1455, %v107_v53  }
  0x61   :  { %602 = vperm.xlu1 %1456, %v124_v54   ;;  %597 = vperm.xlu0 %1455, %v123_v55  }
  0x65   :  { %496 = vperm.xlu1 %1456, %v106_v56   ;;  %491 = vperm.xlu0 %1455, %v105_v57  }
  0x69   :  { %592 = vperm.xlu1 %1456, %v122_v58   ;;  %587 = vperm.xlu0 %1455, %v121_v59  }
  0x6d   :  { %728 = vperm.xlu1 %1456, %v710_v60   ;;  %723 = vperm.xlu0 %1455, %v709_v61  }
  0x71   :  { %738 = vperm.xlu1 %1456, %v712_v62   ;;  %733 = vperm.xlu0 %1455, %v711_v63  }
  0x75   :  { %857 = vperm.xlu1 %1456, %v716_v0   ;;  %852 = vperm.xlu0 %1455, %v715_v1  }
  0x79   :  { %881 = vperm.xlu1 %1456, %v720_v2   ;;  %876 = vperm.xlu0 %1455, %v719_v3  }
  0x7d   :  { %847 = vperm.xlu1 %1456, %v714_v4   ;;  %842 = vperm.xlu0 %1455, %v713_v5  }
  0x81   :  { %871 = vperm.xlu1 %1456, %v718_v6   ;;  %866 = vperm.xlu0 %1455, %v717_v7  }
  0x85   :  { %917 = vperm.xlu1 %1456, %v899_v8   ;;  %912 = vperm.xlu0 %1455, %v898_v9  }
  0x88   :  { %v140_v26 = vpop.permute.xlu0 %139  ;;  %v150_v29 = vpop.permute.xlu1 %149 }
  0x89   :  { %927 = vperm.xlu1 %1456, %v901_v10   ;;  %922 = vperm.xlu0 %1455, %v900_v11  }
  0x8c   :  { %v145_v31 = vpop.permute.xlu0 %144  ;;  %v155_v32 = vpop.permute.xlu1 %154 }
  0x8d   :  { %1049 = vperm.xlu1 %1456, %v905_v12   ;;  %1044 = vperm.xlu0 %1455, %v904_v13  }
  0x90   :  { %v160_v33 = vpop.permute.xlu0 %159  ;;  %v165_v34 = vpop.permute.xlu1 %164 }
  0x91   :  { %1073 = vperm.xlu1 %1456, %v909_v14   ;;  %1068 = vperm.xlu0 %1455, %v908_v15  }
  0x94   :  { %v170_v35 = vpop.permute.xlu0 %169  ;;  %v175_v36 = vpop.permute.xlu1 %174 }
  0x95   :  { %1039 = vperm.xlu1 %1456, %v903_v16   ;;  %1034 = vperm.xlu0 %1455, %v902_v17  }
  0x98   :  { %v180_v37 = vpop.permute.xlu0 %179  ;;  %v1897_v38 = vpop.permute.xlu1 %184 }
  0x99   :  { %1063 = vperm.xlu1 %1456, %v907_v18   ;;  %1058 = vperm.xlu0 %1455, %v906_v19  }
  0x9c   :  { %v190_v39 = vpop.permute.xlu0 %189  ;;  %v1899_v40 = vpop.permute.xlu1 %194 }
  0x9d   :  { %1195 = vperm.xlu1 %1456, %v1187_v20   ;;  %1190 = vperm.xlu0 %1455, %v1186_v21  }
  0xa0   :  { %v1904_v42 = vpop.permute.xlu0 %199  ;;  %v1906_v43 = vpop.permute.xlu1 %204 }
  0xa1   :  { %1239 = vperm.xlu1 %1456, %v1201_v22   ;;  %1234 = vperm.xlu0 %1455, %v1200_v23  }
  0xa4   :  { %v1908_v44 = vpop.permute.xlu0 %209  ;;  %v1910_v45 = vpop.permute.xlu1 %214 }
  0xa5   :  { %1251 = vperm.xlu1 %1456, %v1203_v24   ;;  %1246 = vperm.xlu0 %1455, %v1202_v25  }
  0xa8   :  { %v1912_v46 = vpop.permute.xlu0 %561  ;;  %v1914_v48 = vpop.permute.xlu1 %566 }
  0xa9   :  { %1267 = vperm.xlu1 %1456, %v1259_v27   ;;  %1262 = vperm.xlu0 %1455, %v1258_v28  }
  0xac   :  { %v1916_v51 = vpop.permute.xlu0 %657  ;;  %v1920_v53 = vpop.permute.xlu1 %662 }
  0xad   :  { %1282 = vperm.xlu0 %1455, %v1279_v30  }
  0xb0   :  { %v1934_v63 = vpop.permute.xlu0 %551  ;;  %v1941_v4 = vpop.permute.xlu1 %556 }
  0xb4   :  { %v1953_v16 = vpop.permute.xlu0 %647  ;;  %v1960_v21 = vpop.permute.xlu1 %652 }
  0xb8   :  { %v1980_v41 = vpop.permute.xlu1 %546 }
  0xd6   :  { %v1381_v47 = vpop.f32.mrf.mxu1 }
  0xd7   :  { %v1922_v55 = vadd.f32 %v1381_v47, %v150_v29 }
  0xd8   :  { %v328_v49 = vpop.f32.mrf.mxu1 }
  0xd9   :  { %v1918_v52 = vadd.f32 %v328_v49, %v140_v26  ;;  %v416_v0 = vmul.f32 %v1922_v55, %v1922_v55 }
  0xda   :  { %v1382_v50 = vpop.f32.mrf.mxu1 }
  0xdb   :  { %v414_v58 = vmul.f32 %v1918_v52, %v1918_v52  ;;  %v1928_v59 = vadd.f32 %v1382_v50, %v155_v32 }
  0xdc   :  { %v331_v54 = vpop.f32.mrf.mxu1 }
  0xdd   :  { %v1924_v56 = vadd.f32 %v331_v54, %v145_v31  ;;  %v417_v6 = vmul.f32 %v1928_v59, %v1928_v59 }
  0xde   :  { %v1385_v57 = vpop.f32.mrf.mxu1 }
  0xdf   :  { %v391_v60 = vadd.f32 %v1924_v56, %v1918_v52  ;;  %v415_v61 = vmul.f32 %v1924_v56, %v1924_v56  ;;  %v1946_v9 = vadd.f32 %v1385_v57, %v170_v35 }
  0xe0   :  { %v344_v62 = vpop.f32.mrf.mxu1 }
  0xe1   :  { %v392_v1 = vadd.f32 %v391_v60, %v1922_v55  ;;  %v430_v2 = vadd.f32 %v415_v61, %v414_v58  ;;  %v1939_v3 = vadd.f32 %v344_v62, %v160_v33  ;;  %v420_v23 = vmul.f32 %v1946_v9, %v1946_v9  ;;  %v1972_v33 = vpop.permute.xlu0 %541 }
  0xe2   :  { %v1386_v5 = vpop.f32.mrf.mxu1 }
  0xe3   :  { %v431_v7 = vadd.f32 %v430_v2, %v416_v0  ;;  %v393_v8 = vadd.f32 %v392_v1, %v1928_v59  ;;  %v418_v12 = vmul.f32 %v1939_v3, %v1939_v3  ;;  %v1955_v18 = vadd.f32 %v1386_v5, %v175_v36  ;;  %v1999_v5 = vpop.permute.xlu1 %642 }
  0xe4   :  { %v347_v10 = vpop.f32.mrf.mxu1 }
  0xe5   :  { %v394_v11 = vadd.f32 %v393_v8, %v1939_v3  ;;  %v432_v13 = vadd.f32 %v431_v7, %v417_v6  ;;  %v1951_v14 = vadd.f32 %v347_v10, %v165_v34  ;;  %v421_v28 = vmul.f32 %v1955_v18, %v1955_v18  ;;  %v1994_v0 = vpop.permute.xlu0 %637 }
  0xe6   :  { %v1389_v15 = vpop.f32.mrf.mxu1 }
  0xe7   :  { %v433_v17 = vadd.f32 %v432_v13, %v418_v12  ;;  %v395_v19 = vadd.f32 %v394_v11, %v1951_v14  ;;  %v419_v20 = vmul.f32 %v1951_v14, %v1951_v14  ;;  %v1970_v31 = vadd.f32 %v1389_v15, %v190_v39 }
  0xe8   :  { %v360_v22 = vpop.f32.mrf.mxu1 }
  0xe9   :  { %v396_v24 = vadd.f32 %v395_v19, %v1946_v9  ;;  %v434_v25 = vadd.f32 %v433_v17, %v419_v20  ;;  %v1965_v26 = vadd.f32 %v360_v22, %v180_v37  ;;  %v424_v58 = vmul.f32 %v1970_v31, %v1970_v31  ;;  %v2009_v19 = vpop.permute.xlu0 %531 }
  0xea   :  { %v1390_v27 = vpop.f32.mrf.mxu1 }
  0xeb   :  { %v435_v29 = vadd.f32 %v434_v25, %v420_v23  ;;  %v397_v30 = vadd.f32 %v396_v24, %v1955_v18  ;;  %v422_v35 = vmul.f32 %v1965_v26, %v1965_v26  ;;  %v1983_v50 = vadd.f32 %v1390_v27, %v1899_v40  ;;  %v2014_v23 = vpop.permute.xlu1 %536 }
  0xec   :  { %v363_v32 = vpop.f32.mrf.mxu1 }
  0xed   :  { %v398_v34 = vadd.f32 %v397_v30, %v1965_v26  ;;  %v436_v36 = vadd.f32 %v435_v29, %v421_v28  ;;  %v1978_v37 = vadd.f32 %v363_v32, %v1897_v38  ;;  %v425_v40 = vmul.f32 %v1983_v50, %v1983_v50  ;;  %v2016_v29 = vpop.permute.xlu0 %627 }
  0xee   :  { %v1393_v47 = vpop.f32.mrf.mxu1 }
  0xef   :  { %v437_v49 = vadd.f32 %v436_v36, %v422_v35  ;;  %v399_v39 = vadd.f32 %v398_v34, %v1978_v37  ;;  %v423_v54 = vmul.f32 %v1978_v37, %v1978_v37  ;;  %v2002_v6 = vadd.f32 %v1393_v47, %v1908_v44  ;;  %v2018_v32 = vpop.permute.xlu1 %632 }
  0xf0   :  { %v376_v57 = vpop.f32.mrf.mxu1 }
  0xf1   :  { %v400_v60 = vadd.f32 %v399_v39, %v1970_v31  ;;  %v438_v38 = vadd.f32 %v437_v49, %v423_v54  ;;  %v1992_v61 = vadd.f32 %v376_v57, %v1904_v42  ;;  %v428_v44 = vmul.f32 %v2002_v6, %v2002_v6  ;;  %v2020_v49 = vpop.permute.xlu0 %521 }
  0xf2   :  { %v1394_v62 = vpop.f32.mrf.mxu1 }
  0xf3   :  { %v439_v1 = vadd.f32 %v438_v38, %v424_v58  ;;  %v401_v2 = vadd.f32 %v400_v60, %v1983_v50  ;;  %v426_v42 = vmul.f32 %v1992_v61, %v1992_v61  ;;  %v388_v13 = vadd.f32 %v1394_v62, %v1910_v45  ;;  %v2022_v57 = vpop.permute.xlu1 %526 }
  0xf4   :  { %v379_v7 = vpop.f32.mrf.mxu1 }
  0xf5   :  { %v402_v8 = vadd.f32 %v401_v2, %v1992_v61  ;;  %v440_v10 = vadd.f32 %v439_v1, %v425_v40  ;;  %v380_v11 = vadd.f32 %v379_v7, %v1906_v43  ;;  %v429_v24 = vmul.f32 %v388_v13, %v388_v13  ;;  %v2026_v40 = vpop.permute.xlu0 %617 }
  0xf7   :  { %v441_v12 = vadd.f32 %v440_v10, %v426_v42  ;;  %v403_v15 = vadd.f32 %v402_v8, %v380_v11  ;;  %v427_v17 = vmul.f32 %v380_v11, %v380_v11  ;;  %v2030_v7 = vpop.permute.xlu1 %622 }
  0xf9   :  { %v404_v20 = vadd.f32 %v403_v15, %v2002_v6  ;;  %v442_v22 = vadd.f32 %v441_v12, %v427_v17  ;;  %v2032_v10 = vpop.permute.xlu0 %511 }
  0xfb   :  { %v405_v25 = vadd.f32 %v404_v20, %v388_v13  ;;  %v443_v27 = vadd.f32 %v442_v22, %v428_v44  ;;  %v2034_v15 = vpop.permute.xlu1 %516 }
  0xfd   :  { %v406_v28 = vrot.slane %v405_v25, 4  ;;  %v444_v43 = vadd.f32 %v443_v27, %v429_v24  ;;  %v2036_v17 = vpop.permute.xlu0 %607 }
  0xff   :  { %v407_v45 = vadd.f32 %v406_v28, %v405_v25  ;;  %v445_v30 = vrot.slane %v444_v43, 4  ;;  %v2038_v44 = vpop.permute.xlu1 %612 }
 0x101   :  { %v408_v34 = vrot.slane %v407_v45, 2  ;;  %v446_v35 = vadd.f32 %v445_v30, %v444_v43  ;;  %v2040_v20 = vpop.permute.xlu0 %501 }
 0x103   :  { %v409_v36 = vadd.f32 %v408_v34, %v407_v45  ;;  %v447_v47 = vrot.slane %v446_v35, 2  ;;  %v2045_v25 = vpop.permute.xlu1 %506 }
 0x105   :  { %v410_v39 = vrot.slane %v409_v36, 1  ;;  %v448_v54 = vadd.f32 %v447_v47, %v446_v35 }
 0x107   :  { %v411_v58 = vadd.f32 %v410_v39, %v409_v36  ;;  %v449_v60 = vrot.slane %v448_v54, 1 }
 0x109   :  { %v2024_v38 = vmul.f32 0.0078125, %v411_v58  ;;  %v450_v62 = vadd.f32 %v449_v60, %v448_v54  ;;  %v603_v60 = vpop.permute.xlu1 %602 }
 0x10b   :  { %v451_v1 = vmul.f32 0.0078125, %v450_v62  ;;  %v452_v2 = vmul.f32 %v2024_v38, %v2024_v38  ;;  %v470_v22 = vsub.f32 %v380_v11, %v2024_v38  ;;  %v471_v24 = vsub.f32 %v2002_v6, %v2024_v38 }
 0x10c   :  { %v472_v27 = vsub.f32 %v388_v13, %v2024_v38  ;;  %v469_v28 = vsub.f32 %v1992_v61, %v2024_v38  ;;  %v467_v43 = vsub.f32 %v1970_v31, %v2024_v38  ;;  %v468_v45 = vsub.f32 %v1983_v50, %v2024_v38 }
 0x10d   :  { %v453_v8 = vsub.f32 %v451_v1, %v452_v2  ;;  %v465_v30 = vsub.f32 %v1965_v26, %v2024_v38  ;;  %v466_v11 = vsub.f32 %v1978_v37, %v2024_v38  ;;  %v463_v6 = vsub.f32 %v1946_v9, %v2024_v38 }
 0x10e   :  { %v464_v13 = vsub.f32 %v1955_v18, %v2024_v38  ;;  %v461_v31 = vsub.f32 %v1939_v3, %v2024_v38  ;;  %v462_v50 = vsub.f32 %v1951_v14, %v2024_v38  ;;  %v459_v26 = vsub.f32 %v1922_v55, %v2024_v38  ;;  %v598_v55 = vpop.permute.xlu0 %597 }
 0x10f   :  { %v454_v42 = vmax.f32 %v453_v8, 0.0  ;;  %v460_v37 = vsub.f32 %v1928_v59, %v2024_v38 }
 0x111   :  { %v455_v12 = vadd.f32 1e-05, %v454_v42 }
 0x113   :  { %1473 = vrsqrt.f32 %v455_v12 }
 0x120   :  { %v2062_v34 = vpop.eup %1473 }
 0x121   :  { %v486_v61 = vmul.f32 %v2062_v34, %v470_v22  ;;  %v487_v9 = vmul.f32 %v2062_v34, %v471_v24  ;;  %v488_v18 = vmul.f32 %v2062_v34, %v472_v27  ;;  %v485_v35 = vmul.f32 %v2062_v34, %v469_v28  ;;  %v497_v28 = vpop.permute.xlu1 %496 }
 0x122   :  { %v483_v36 = vmul.f32 %v2062_v34, %v467_v43  ;;  %v484_v3 = vmul.f32 %v2062_v34, %v468_v45  ;;  %v481_v14 = vmul.f32 %v2062_v34, %v465_v30  ;;  %v482_v47 = vmul.f32 %v2062_v34, %v466_v11 }
 0x123   :  { %v583_v39 = vmul.f32 %v1912_v46, %v487_v9  ;;  %v584_v59 = vmul.f32 %v1914_v48, %v488_v18  ;;  %v581_v54 = vmul.f32 %v1934_v63, %v485_v35  ;;  %v582_v58 = vmul.f32 %v1941_v4, %v486_v61 }
 0x124   :  { %v579_v62 = vmul.f32 %v1972_v33, %v483_v36  ;;  %v580_v1 = vmul.f32 %v1980_v41, %v484_v3  ;;  %v577_v2 = vmul.f32 %v2009_v19, %v481_v14  ;;  %v578_v8 = vmul.f32 %v2014_v23, %v482_v47 }
 0x125   :  { %v679_v42 = vadd.f32 %v1916_v51, %v583_v39  ;;  %v680_v12 = vadd.f32 %v1920_v53, %v584_v59  ;;  %v677_v46 = vadd.f32 %v1953_v16, %v581_v54  ;;  %v678_v48 = vadd.f32 %v1960_v21, %v582_v58  ;;  %v492_v21 = vpop.permute.xlu0 %491  ;;  %v593_v39 = vpop.permute.xlu1 %592 }
 0x126   :  { %v675_v63 = vadd.f32 %v1994_v0, %v579_v62  ;;  %v676_v4 = vadd.f32 %v1999_v5, %v580_v1  ;;  %v673_v33 = vadd.f32 %v2016_v29, %v577_v2  ;;  %v674_v41 = vadd.f32 %v2018_v32, %v578_v8  ;;  %v1468_v2 = vld [vmem:[%s2196_s5 + $0x8] sm:$0xff]   ;;  %v1469_v8 = vld [vmem:[%s2200_s9] sm:$0xff]  }
 0x127   :  { %v695_v22 = vmax.f32 %v679_v42, 0.0  ;;  %v696_v19 = vmax.f32 %v680_v12, 0.0  ;;  %v693_v24 = vmax.f32 %v677_v46, 0.0  ;;  %v694_v23 = vmax.f32 %v678_v48, 0.0  ;;  %1419 = vmatprep.mubr.msk.bf16.mxu0 %vm269_vm0, %v1469_v8 }
 0x128   :  { %v691_v27 = vmax.f32 %v675_v63, 0.0  ;;  %v692_v51 = vmax.f32 %v676_v4, 0.0  ;;  %v457_v53 = vsub.f32 %v1918_v52, %v2024_v38  ;;  %v458_v16 = vsub.f32 %v1924_v56, %v2024_v38 }
 0x129   :  { %v2100_v0 = vpack.c.bf16 %v696_v19, %v695_v22  ;;  %v2102_v5 = vpack.c.bf16 %v694_v23, %v693_v24  ;;  %v689_v29 = vmax.f32 %v673_v33, 0.0  ;;  %v479_v32 = vmul.f32 %v2062_v34, %v463_v6  ;;  %v729_v48 = vpop.permute.xlu1 %728 }
 0x12a   :  { %v690_v43 = vmax.f32 %v674_v41, 0.0  ;;  %v480_v45 = vmul.f32 %v2062_v34, %v464_v13  ;;  %v477_v30 = vmul.f32 %v2062_v34, %v461_v31  ;;  %v478_v11 = vmul.f32 %v2062_v34, %v462_v50 }
 0x12b   :  { %1395 = vmatprep.subr.bf16.mxu1 %v2100_v0  ;;  %v2109_v52 = vpack.c.bf16 %v692_v51, %v691_v27  ;;  %v575_v56 = vmul.f32 %v2020_v49, %v479_v32  ;;  %v475_v38 = vmul.f32 %v2062_v34, %v459_v26  ;;  %v476_v61 = vmul.f32 %v2062_v34, %v460_v37 }
 0x12c   :  { %1396 = vmatpush3.bf16.msra.mxu1 %v2100_v0  ;;  %v576_v6 = vmul.f32 %v2022_v57, %v480_v45  ;;  %v573_v13 = vmul.f32 %v2032_v10, %v477_v30  ;;  %v574_v31 = vmul.f32 %v2034_v15, %v478_v11  ;;  %v473_v50 = vmul.f32 %v2062_v34, %v457_v53  ;;  %v588_v15 = vpop.permute.xlu0 %587 }
 0x12d   :  { %1397 = vmatprep.subr.bf16.mxu1 %v2102_v5  ;;  %v671_v9 = vadd.f32 %v2026_v40, %v575_v56  ;;  %v571_v49 = vmul.f32 %v2040_v20, %v475_v38  ;;  %v572_v26 = vmul.f32 %v2045_v25, %v476_v61  ;;  %v474_v37 = vmul.f32 %v2062_v34, %v458_v16  ;;  %v739_v23 = vpop.permute.xlu1 %738 }
 0x12e   :  { %v672_v18 = vadd.f32 %v2030_v7, %v576_v6  ;;  %v669_v57 = vadd.f32 %v2036_v17, %v573_v13  ;;  %v670_v10 = vadd.f32 %v2038_v44, %v574_v31  ;;  %v569_v35 = vmul.f32 %v492_v21, %v473_v50 }
 0x12f   :  { %v687_v36 = vmax.f32 %v671_v9, 0.0  ;;  %v667_v3 = vadd.f32 %v598_v55, %v571_v49  ;;  %v668_v14 = vadd.f32 %v603_v60, %v572_v26  ;;  %v570_v47 = vmul.f32 %v497_v28, %v474_v37 }
 0x130   :  { %1398 = vmatpush3.bf16.msra.mxu1 %v2102_v5  ;;  %v688_v40 = vmax.f32 %v672_v18, 0.0  ;;  %v685_v20 = vmax.f32 %v669_v57, 0.0  ;;  %v686_v25 = vmax.f32 %v670_v10, 0.0  ;;  %v665_v59 = vadd.f32 %v588_v15, %v569_v35  ;;  %v724_v12 = vpop.permute.xlu0 %723 }
 0x131   :  { %1399 = vmatprep.subr.bf16.mxu1 %v2109_v52  ;;  %v683_v7 = vmax.f32 %v667_v3, 0.0  ;;  %v684_v34 = vmax.f32 %v668_v14, 0.0  ;;  %v666_v17 = vadd.f32 %v593_v39, %v570_v47  ;;  %v2133_v55 = vpack.c.bf16 %v690_v43, %v689_v29  ;;  %v858_v3 = vpop.permute.xlu1 %857 }
 0x132   :  { %v2129_v54 = vpack.c.bf16 %v688_v40, %v687_v36  ;;  %v2131_v44 = vpack.c.bf16 %v686_v25, %v685_v20  ;;  %v681_v58 = vmax.f32 %v665_v59, 0.0  ;;  %v1508_v42 = vmov 0.0  }
 0x133   :  { %v2135_v60 = vpack.c.bf16 %v684_v34, %v683_v7  ;;  %v682_v62 = vmax.f32 %v666_v17, 0.0 }
 0x134   :  { %1400 = vmatpush3.bf16.msra.mxu1 %v2109_v52  ;;  %v734_v41 = vpop.permute.xlu0 %733 }
 0x135   :  { %1401 = vmatprep.subr.bf16.mxu1 %v2133_v55  ;;  %v2139_v1 = vpack.c.bf16 %v682_v62, %v681_v58  ;;  %v882_v47 = vpop.permute.xlu1 %881 }
 0x138   :  { %1402 = vmatpush3.bf16.msra.mxu1 %v2133_v55  ;;  %v853_v14 = vpop.permute.xlu0 %852 }
 0x139   :  { %1403 = vmatprep.subr.bf16.mxu1 %v2129_v54  ;;  %v848_v40 = vpop.permute.xlu1 %847 }
 0x13c   :  { %1404 = vmatpush3.bf16.msra.mxu1 %v2129_v54  ;;  %v877_v39 = vpop.permute.xlu0 %876 }
 0x13d   :  { %1405 = vmatprep.subr.bf16.mxu1 %v2131_v44 }
 0x140   :  { %1406 = vmatpush3.bf16.msra.mxu1 %v2131_v44  ;;  %v843_v20 = vpop.permute.xlu0 %842 }
 0x141   :  { %1407 = vmatprep.subr.bf16.mxu1 %v2135_v60 }
 0x144   :  { %1408 = vmatpush3.bf16.msra.mxu1 %v2135_v60 }
 0x145   :  { %1409 = vmatprep.subr.bf16.mxu1 %v2139_v1 }
 0x148   :  { %1410 = vmatpush3.bf16.msra.mxu1 %v2139_v1 }
 0x149   :  { %1423 = vmatprep.subr.bf16.mxu1 %v1508_v42 }
 0x14b   :  { %1412 = vmatmul.mubr.bf16.vlgmr.msra.gmra.mxu1 %v1468_v2 }
 0x14c   :  { %1427 = vmatprep.mubr.msk.bf16.mxu1 %vm1509_vm1, %v1508_v42 }
 0x20b   :  { %v1413_v46 = vpop.f32.mrf.mxu1 }
 0x20c   :  { %v796_v19 = vadd.f32 %v1413_v46, %v734_v41  ;;  %v867_v41 = vpop.permute.xlu0 %866 }
 0x20d   :  { %v787_v63 = vpop.f32.mrf.mxu1 }
 0x20e   :  { %v788_v33 = vadd.f32 %v787_v63, %v724_v12  ;;  %v815_v21 = vmul.f32 %v796_v19, %v796_v19 }
 0x20f   :  { %v1414_v4 = vpop.f32.mrf.mxu1 }
 0x210   :  { %v813_v27 = vmul.f32 %v788_v33, %v788_v33  ;;  %v799_v51 = vadd.f32 %v1414_v4, %v739_v23  ;;  %v872_v4 = vpop.permute.xlu1 %871 }
 0x211   :  { %v790_v22 = vpop.f32.mrf.mxu1 }
 0x212   :  { %v791_v24 = vadd.f32 %v790_v22, %v729_v48  ;;  %v816_v28 = vmul.f32 %v799_v51, %v799_v51 }
 0x214   :  { %v802_v53 = vadd.f32 %v791_v24, %v788_v33  ;;  %v814_v16 = vmul.f32 %v791_v24, %v791_v24 }
 0x216   :  { %v803_v29 = vadd.f32 %v802_v53, %v796_v19  ;;  %v817_v32 = vadd.f32 %v814_v16, %v813_v27 }
 0x218   :  { %v804_v43 = vadd.f32 %v803_v29, %v799_v51  ;;  %v818_v45 = vadd.f32 %v817_v32, %v815_v21  ;;  %v1470_v29 = vld [vmem:[%s2200_s9 + $0x8] sm:$0xff]  }
 0x21a   :  { %v805_v30 = vrot.slane %v804_v43, 4  ;;  %v819_v11 = vadd.f32 %v818_v45, %v816_v28 }
 0x21c   :  { %v806_v56 = vadd.f32 %v805_v30, %v804_v43  ;;  %v820_v38 = vrot.slane %v819_v11, 4 }
 0x21e   :  { %v807_v61 = vrot.slane %v806_v56, 2  ;;  %v821_v6 = vadd.f32 %v820_v38, %v819_v11 }
 0x220   :  { %v808_v13 = vadd.f32 %v807_v61, %v806_v56  ;;  %v822_v31 = vrot.slane %v821_v6, 2 }
 0x222   :  { %v809_v50 = vrot.slane %v808_v13, 1  ;;  %v823_v9 = vadd.f32 %v822_v31, %v821_v6 }
 0x224   :  { %v810_v49 = vadd.f32 %v809_v50, %v808_v13  ;;  %v824_v26 = vrot.slane %v823_v9, 1 }
 0x226   :  { %v812_v37 = vmul.f32 0.03125, %v810_v49  ;;  %v825_v18 = vadd.f32 %v824_v26, %v823_v9 }
 0x228   :  { %v826_v57 = vmul.f32 0.03125, %v825_v18  ;;  %v827_v10 = vmul.f32 %v812_v37, %v812_v37  ;;  %v833_v25 = vsub.f32 %v791_v24, %v812_v37  ;;  %v834_v59 = vsub.f32 %v796_v19, %v812_v37 }
 0x229   :  { %v835_v7 = vsub.f32 %v799_v51, %v812_v37  ;;  %v832_v34 = vsub.f32 %v788_v33, %v812_v37 }
 0x22a   :  { %v828_v35 = vsub.f32 %v826_v57, %v827_v10 }
 0x22c   :  { %v829_v15 = vmax.f32 %v828_v35, 0.0 }
 0x22e   :  { %v830_v36 = vadd.f32 1e-05, %v829_v15 }
 0x230   :  { %1475 = vrsqrt.f32 %v830_v36 }
 0x23d   :  { %v1476_v17 = vpop.eup %1475 }
 0x23e   :  { %v837_v58 = vmul.f32 %v1476_v17, %v833_v25  ;;  %v838_v62 = vmul.f32 %v1476_v17, %v834_v59  ;;  %v839_v2 = vmul.f32 %v1476_v17, %v835_v7  ;;  %v836_v8 = vmul.f32 %v1476_v17, %v832_v34 }
 0x240   :  { %v862_v12 = vmul.f32 %v853_v14, %v838_v62  ;;  %v863_v46 = vmul.f32 %v858_v3, %v839_v2  ;;  %v860_v48 = vmul.f32 %v843_v20, %v836_v8  ;;  %v861_v63 = vmul.f32 %v848_v40, %v837_v58 }
 0x242   :  { %v886_v22 = vadd.f32 %v877_v39, %v862_v12  ;;  %v887_v23 = vadd.f32 %v882_v47, %v863_v46  ;;  %v884_v27 = vadd.f32 %v867_v41, %v860_v48  ;;  %v885_v53 = vadd.f32 %v872_v4, %v861_v63 }
 0x244   :  { %v890_v16 = vmax.f32 %v886_v22, 0.0  ;;  %v891_v24 = vmax.f32 %v887_v23, 0.0  ;;  %v888_v19 = vmax.f32 %v884_v27, 0.0  ;;  %v889_v51 = vmax.f32 %v885_v53, 0.0 }
 0x246   :  { %v893_v33 = vpack.c.bf16 %v891_v24, %v890_v16  ;;  %v892_v21 = vpack.c.bf16 %v889_v51, %v888_v19 }
 0x248   :  { %1415 = vmatprep.subr.bf16.mxu0 %v893_v33 }
 0x249   :  { %1416 = vmatpush3.bf16.msra.mxu0 %v893_v33 }
 0x24a   :  { %1417 = vmatprep.subr.bf16.mxu0 %v892_v21 }
 0x24d   :  { %1418 = vmatpush3.bf16.msra.mxu0 %v892_v21 }
 0x24e   :  { %1431 = vmatprep.subr.bf16.mxu0 %v1508_v42 }
 0x250   :  { %1420 = vmatmul.mubr.msk.bf16.vlgmr.msra.gmra.mxu0 %vm269_vm0, %v1470_v29 }
 0x251   :  { %1432 = vmatpush3.bf16.msra.mxu0 %v2100_v0  ;;  %v1471_v0 = vld [vmem:[%s2204_s13] sm:$0xff]   ;;  %1447 = vmatprep.mubr.msk.bf16.mxu0 %vm1509_vm1, %v1508_v42 }
 0x252   :  { %1433 = vmatprep.subr.bf16.mxu0 %v1508_v42 }
 0x255   :  { %1434 = vmatpush3.bf16.msra.mxu0 %v2102_v5  ;;  %v913_v5 = vpop.permute.xlu0 %912 }
 0x256   :  { %1435 = vmatprep.subr.bf16.mxu0 %v1508_v42 }
 0x259   :  { %1436 = vmatpush3.bf16.msra.mxu0 %v2109_v52  ;;  %v923_v32 = vpop.permute.xlu0 %922 }
 0x25a   :  { %1437 = vmatprep.subr.bf16.mxu0 %v1508_v42 }
 0x25d   :  { %1438 = vmatpush3.bf16.msra.mxu0 %v2133_v55  ;;  %v1045_v58 = vpop.permute.xlu0 %1044 }
 0x25e   :  { %1439 = vmatprep.subr.bf16.mxu0 %v1508_v42 }
 0x261   :  { %1440 = vmatpush3.bf16.msra.mxu0 %v2129_v54  ;;  %v918_v54 = vpop.permute.xlu1 %917  ;;  %v1069_v2 = vpop.permute.xlu0 %1068 }
 0x262   :  { %1441 = vmatprep.subr.bf16.mxu0 %v1508_v42 }
 0x265   :  { %1442 = vmatpush3.bf16.msra.mxu0 %v2131_v44  ;;  %v928_v45 = vpop.permute.xlu1 %927  ;;  %v1035_v12 = vpop.permute.xlu0 %1034 }
 0x266   :  { %1443 = vmatprep.subr.bf16.mxu0 %v1508_v42 }
 0x269   :  { %1444 = vmatpush3.bf16.msra.mxu0 %v2135_v60  ;;  %v1050_v17 = vpop.permute.xlu1 %1049  ;;  %v1059_v21 = vpop.permute.xlu0 %1058 }
 0x26a   :  { %1445 = vmatprep.subr.bf16.mxu0 %v1508_v42 }
 0x26d   :  { %1446 = vmatpush3.bf16.msra.mxu0 %v2139_v1  ;;  %v1074_v62 = vpop.permute.xlu1 %1073 }
 0x270   :  { %1448 = vmatmul.mubr.bf16.vlgmr.msra.gmra.mxu0 %v1471_v0 }
 0x271   :  { %v1040_v8 = vpop.permute.xlu1 %1039 }
 0x275   :  { %v1064_v33 = vpop.permute.xlu1 %1063 }
 0x310   :  { %v1421_v52 = vpop.f32.mrf.mxu0 }
 0x311   :  { %v989_v43 = vadd.f32 %v1421_v52, %v923_v32 }
 0x312   :  { %v980_v44 = vpop.f32.mrf.mxu0 }
 0x313   :  { %v981_v60 = vadd.f32 %v980_v44, %v913_v5  ;;  %v1007_v61 = vmul.f32 %v989_v43, %v989_v43 }
 0x314   :  { %v1422_v55 = vpop.f32.mrf.mxu0 }
 0x315   :  { %v1005_v30 = vmul.f32 %v981_v60, %v981_v60  ;;  %v992_v11 = vadd.f32 %v1422_v55, %v928_v45 }
 0x316   :  { %v983_v28 = vpop.f32.mrf.mxu0 }
 0x317   :  { %v984_v1 = vadd.f32 %v983_v28, %v918_v54  ;;  %v1008_v31 = vmul.f32 %v992_v11, %v992_v11 }
 0x319   :  { %v995_v56 = vadd.f32 %v984_v1, %v981_v60  ;;  %v1006_v38 = vmul.f32 %v984_v1, %v984_v1 }
 0x31b   :  { %v996_v6 = vadd.f32 %v995_v56, %v989_v43  ;;  %v1009_v13 = vadd.f32 %v1006_v38, %v1005_v30 }
 0x31d   :  { %v997_v50 = vadd.f32 %v996_v6, %v992_v11  ;;  %v1010_v9 = vadd.f32 %v1009_v13, %v1007_v61  ;;  %v1191_v6 = vpop.permute.xlu0 %1190 }
 0x31f   :  { %v998_v49 = vrot.slane %v997_v50, 4  ;;  %v1011_v26 = vadd.f32 %v1010_v9, %v1008_v31 }
 0x321   :  { %v999_v37 = vadd.f32 %v998_v49, %v997_v50  ;;  %v1012_v18 = vrot.slane %v1011_v26, 4 }
 0x323   :  { %v1000_v57 = vrot.slane %v999_v37, 2  ;;  %v1013_v10 = vadd.f32 %v1012_v18, %v1011_v26 }
 0x325   :  { %v1001_v35 = vadd.f32 %v1000_v57, %v999_v37  ;;  %v1014_v15 = vrot.slane %v1013_v10, 2 }
 0x327   :  { %v1002_v36 = vrot.slane %v1001_v35, 1  ;;  %v1015_v3 = vadd.f32 %v1014_v15, %v1013_v10 }
 0x329   :  { %v1003_v14 = vadd.f32 %v1002_v36, %v1001_v35  ;;  %v1016_v47 = vrot.slane %v1015_v3, 1 }
 0x32b   :  { %v1004_v39 = vmul.f32 0.03125, %v1003_v14  ;;  %v1017_v40 = vadd.f32 %v1016_v47, %v1015_v3 }
 0x32d   :  { %v1018_v20 = vmul.f32 0.03125, %v1017_v40  ;;  %v1019_v25 = vmul.f32 %v1004_v39, %v1004_v39  ;;  %v1025_v46 = vsub.f32 %v984_v1, %v1004_v39  ;;  %v1026_v48 = vsub.f32 %v989_v43, %v1004_v39  ;;  %v1472_v43 = vld [vmem:[%s2205_s14] sm:$0xff]   ;;  %s1510_s14 = smov [#allocation3]  }
 0x32e   :  { %v1027_v63 = vsub.f32 %v992_v11, %v1004_v39  ;;  %v1024_v4 = vsub.f32 %v981_v60, %v1004_v39  ;;  %s1303_s22 = sshll.u32 %s1510_s14, 4  ;;  %s1304_s22 = int_to_ptr.vmem [resolvable:$true] %s1303_s22 }
 0x32f   :  { %v1020_v59 = vsub.f32 %v1018_v20, %v1019_v25  ;;  %s1485_s7 = scalar_lea.vmem %s1304_s22, 16  ;;  %s1489_s24 = scalar_lea.vmem %s1304_s22, 32 }
 0x330   :  { %v1179_v1 = vpop.f32.mrf.mxu0  ;;  %p1486_p0 = scmp.ne.s32.totalorder %s1304_s22, %s1485_s7  ;;  %p1490_p1 = scmp.lt.s32.totalorder %s1304_s22, %s1304_s22 }
 0x331   :  { %v1021_v7 = vmax.f32 %v1020_v59, 0.0  ;;  %p1491_p2 = scmp.lt.s32.totalorder %s1489_s24, %s1485_s7 }
 0x332   :  { %v1449_v45 = vpop.f32.mrf.mxu0 }
 0x333   :  { %v1022_v34 = vadd.f32 1e-05, %v1021_v7  ;;  %p1492_p3 = por %p1491_p2, %p1490_p1 }
 0x334   :  { %v1182_v30 = vpop.f32.mrf.mxu0 }
 0x335   :  { %1477 = vrsqrt.f32 %v1022_v34  ;;  %p1493_p4 = pnand %p1492_p3, %p1486_p0 }
 0x336   :  { %v1450_v11 = vpop.f32.mrf.mxu0 }
 0x342   :  { %v1478_v41 = vpop.eup %1477 }
 0x343   :  { %v1029_v22 = vmul.f32 %v1478_v41, %v1025_v46  ;;  %v1030_v23 = vmul.f32 %v1478_v41, %v1026_v48  ;;  %v1031_v27 = vmul.f32 %v1478_v41, %v1027_v63  ;;  %v1028_v53 = vmul.f32 %v1478_v41, %v1024_v4 }
 0x345   :  { %v1053_v16 = vmul.f32 %v1040_v8, %v1029_v22  ;;  %v1054_v24 = vmul.f32 %v1045_v58, %v1030_v23  ;;  %v1055_v19 = vmul.f32 %v1050_v17, %v1031_v27  ;;  %v1052_v51 = vmul.f32 %v1035_v12, %v1028_v53  ;;  %v1235_v12 = vpop.permute.xlu0 %1234 }
 0x347   :  { %v1078_v29 = vadd.f32 %v1069_v2, %v1054_v24  ;;  %v1079_v0 = vadd.f32 %v1074_v62, %v1055_v19  ;;  %v1076_v5 = vadd.f32 %v1059_v21, %v1052_v51  ;;  %v1077_v52 = vadd.f32 %v1064_v33, %v1053_v16 }
 0x349   :  { %v1082_v54 = vmax.f32 %v1078_v29, 0.0  ;;  %v1083_v44 = vmax.f32 %v1079_v0, 0.0  ;;  %v1080_v32 = vmax.f32 %v1076_v5, 0.0  ;;  %v1081_v60 = vmax.f32 %v1077_v52, 0.0  ;;  %v1247_v23 = vpop.permute.xlu0 %1246 }
 0x34a   :  { %v1285_v5 = vlaneseq }
 0x34b   :  { %v1089_v55 = vpack.c.bf16 %v1083_v44, %v1082_v54  ;;  %v1088_v28 = vpack.c.bf16 %v1081_v60, %v1080_v32 }
 0x34c   :  { %v1286_v44 = vshrl.u32 %v1285_v5, 7 }
 0x34d   :  { %1424 = vmatpush3.bf16.msra.mxu1 %v1089_v55  ;;  %v1263_v21 = vpop.permute.xlu0 %1262 }
 0x34e   :  { %1425 = vmatprep.subr.bf16.mxu1 %v1508_v42  ;;  %v1196_v42 = vpop.permute.xlu1 %1195  ;;  %v1287_v60 = vsub.s32 0, %v1286_v44 }
 0x351   :  { %1426 = vmatpush3.bf16.msra.mxu1 %v1088_v28 }
 0x352   :  { %v1240_v8 = vpop.permute.xlu1 %1239 }
 0x354   :  { %1428 = vmatmul.mubr.msk.bf16.vlgmr.msra.gmra.mxu1 %vm269_vm0, %v1472_v43  ;;  %v1283_v43 = vpop.permute.xlu0 %1282 }
 0x355   :  { %v1288_v45 = vrot.slane %v1283_v43, %v1287_v60 }
 0x356   :  { %v1252_v22 = vpop.permute.xlu1 %1251 }
 0x35a   :  { %v1268_v33 = vpop.permute.xlu1 %1267 }
 0x414   :  { %v1132_v56 = vpop.f32.mrf.mxu1 }
 0x415   :  { %v1180_v38 = vadd.f32 %v1179_v1, %v1132_v56 }
 0x416   :  { %v1429_v61 = vpop.f32.mrf.mxu1 }
 0x417   :  { %v1198_v31 = vadd.f32 %v1191_v6, %v1180_v38 }
 0x418   :  { %v1135_v13 = vpop.f32.mrf.mxu1 }
 0x419   :  { %v1183_v50 = vadd.f32 %v1182_v30, %v1135_v13  ;;  %v1213_v26 = vmul.f32 %v1198_v31, %v1198_v31 }
 0x41a   :  { %v1430_v9 = vpop.f32.mrf.mxu1 }
 0x41b   :  { %v1199_v49 = vadd.f32 %v1196_v42, %v1183_v50 }
 0x41d   :  { %v1204_v37 = vadd.f32 %v1199_v49, %v1198_v31  ;;  %v1214_v18 = vmul.f32 %v1199_v49, %v1199_v49 }
 0x41f   :  { %v1205_v57 = vrot.slane %v1204_v37, 4  ;;  %v1215_v10 = vadd.f32 %v1214_v18, %v1213_v26 }
 0x421   :  { %v1206_v35 = vadd.f32 %v1205_v57, %v1204_v37  ;;  %v1216_v15 = vrot.slane %v1215_v10, 4 }
 0x423   :  { %v1207_v36 = vrot.slane %v1206_v35, 2  ;;  %v1217_v3 = vadd.f32 %v1216_v15, %v1215_v10 }
 0x425   :  { %v1208_v14 = vadd.f32 %v1207_v36, %v1206_v35  ;;  %v1218_v47 = vrot.slane %v1217_v3, 2 }
 0x427   :  { %v1209_v39 = vrot.slane %v1208_v14, 1  ;;  %v1219_v40 = vadd.f32 %v1218_v47, %v1217_v3 }
 0x429   :  { %v1210_v20 = vadd.f32 %v1209_v39, %v1208_v14  ;;  %v1220_v25 = vrot.slane %v1219_v40, 1 }
 0x42b   :  { %v1212_v59 = vmul.f32 0.0625, %v1210_v20  ;;  %v1221_v7 = vadd.f32 %v1220_v25, %v1219_v40 }
 0x42d   :  { %v1222_v34 = vmul.f32 0.0625, %v1221_v7  ;;  %v1223_v17 = vmul.f32 %v1212_v59, %v1212_v59  ;;  %v1228_v46 = vsub.f32 %v1198_v31, %v1212_v59  ;;  %v1229_v48 = vsub.f32 %v1199_v49, %v1212_v59 }
 0x42f   :  { %v1224_v58 = vsub.f32 %v1222_v34, %v1223_v17 }
 0x431   :  { %v1225_v62 = vmax.f32 %v1224_v58, 0.0 }
 0x433   :  { %v1226_v2 = vadd.f32 1e-05, %v1225_v62 }
 0x435   :  { %1479 = vrsqrt.f32 %v1226_v2 }
 0x442   :  { %v1480_v63 = vpop.eup %1479 }
 0x443   :  { %v1230_v4 = vmul.f32 %v1480_v63, %v1228_v46  ;;  %v1231_v41 = vmul.f32 %v1480_v63, %v1229_v48 }
 0x445   :  { %v1242_v27 = vmul.f32 %v1235_v12, %v1230_v4  ;;  %v1243_v53 = vmul.f32 %v1240_v8, %v1231_v41 }
 0x447   :  { %v1254_v16 = vadd.f32 %v1247_v23, %v1242_v27  ;;  %v1255_v24 = vadd.f32 %v1252_v22, %v1243_v53 }
 0x449   :  { %v1256_v19 = vmax.f32 %v1254_v16, 0.0  ;;  %v1257_v51 = vmax.f32 %v1255_v24, 0.0 }
 0x44b   :  { %v1270_v29 = vmul.f32 %v1263_v21, %v1256_v19  ;;  %v1271_v0 = vmul.f32 %v1268_v33, %v1257_v51 }
 0x44d   :  { %v1272_v52 = vadd.f32 %v1271_v0, %v1270_v29 }
 0x44f   :  { %v1273_v54 = vrot.slane %v1272_v52, 4 }
 0x451   :  { %v1274_v55 = vadd.f32 %v1273_v54, %v1272_v52 }
 0x453   :  { %v1275_v32 = vrot.slane %v1274_v55, 2 }
 0x455   :  { %v1276_v28 = vadd.f32 %v1275_v32, %v1274_v55 }
 0x457   :  { %v1277_v1 = vrot.slane %v1276_v28, 1 }
 0x459   :  { %v1278_v30 = vadd.f32 %v1277_v1, %v1276_v28 }
 0x45b   :  { %v1289_v11 = vadd.f32 %v1288_v45, %v1278_v30 }
 0x45d   :  { %v1338_v56 = vmul.f32 -1.442695, %v1289_v11 }
 0x45f   :  { %1481 = vpow2.f32 %v1338_v56 }
 0x46c   :  { %v1482_v38 = vpop.eup %1481 }
 0x46d   :  { %v1293_v61 = vadd.f32 1.0, %v1482_v38 }
 0x46f   :  { %1483 = vrcp.f32 %v1293_v61 }
 0x47c   :  { %v1484_v6 = vpop.eup %1483 }
 0x47d   :  { %1296 = vst [vmem:[#allocation3] sm:$0x1] %v1484_v6 }
 0x47e   :  { %1496 = shalt.err (!%p1493_p4)
}
 0x47f   :  { %1306 = dma.vmem_to_hbm [thread:$0]  %s1304_s22, 16, %s2211_s20, [#allocation4]  }
 0x480   :  { %1505 = dma.done.wait [#allocation4], 16  }
 0x481   :  { %1506 = vsyncadd [#allocation4], 4294967280 }
 0x482   :  { %1310 = vsyncpa [#allocation4], 1 }

</bundles_post_ra>
